<compile_context>
chip_gen: v7x
topology: tpu7x:2x2x1
jax: 0.10.0
libtpu: 0.0.40
codegen_flags: <defaults>
</compile_context>

<pallas_src>
import jax
import jax.numpy as jnp
from jax.experimental import pallas as pl
from jax.experimental.pallas import tpu as pltpu


def _round_up(x, m):
    return ((x + m - 1) // m) * m


def _dense_head_kernel(x_ref, w0_ref, b0_ref, *rest):
    """K-tiled first layer + fused small-layer tail.

    rest = (w1, b1, ..., wN, bN, out_ref, acc_ref).  acc_ref is an f32 VMEM
    scratch accumulator for the first (huge) Linear; the tail layers run only
    on the last K step.
    """
    out_ref, acc_ref = rest[-2], rest[-1]
    tail_refs = rest[:-2]

    k = pl.program_id(0)

    @pl.when(k == 0)
    def _init():
        acc_ref[...] = jnp.zeros_like(acc_ref)

    # Stream one (tk, N0) slab of W0 per grid step; bf16 inputs, f32 accum.
    acc_ref[...] += jnp.dot(
        x_ref[...], w0_ref[...], preferred_element_type=jnp.float32
    )

    @pl.when(k == pl.num_programs(0) - 1)
    def _finalize():
        # First-layer bias added exactly once (NOT inside the K loop).
        h = acc_ref[...] + b0_ref[...].astype(jnp.float32)
        for i in range(0, len(tail_refs), 2):
            w = tail_refs[i][...]                            # (in, out) bf16
            b = tail_refs[i + 1][...].astype(jnp.float32)    # (1, out)  f32
            h = jnp.dot(
                h.astype(w.dtype), w, preferred_element_type=jnp.float32
            ) + b
        out_ref[...] = h.astype(out_ref.dtype)


def dense_head_pallas(x_flat, params, *, tk=2048, lane_pad=128,
                      weight_dtype=jnp.bfloat16):
    """Run the whole Linear stack in a single K-tiled Pallas kernel.

    params: list of (W, b) with W pre-transposed to (in, out), f32.
    """
    B, K = x_flat.shape
    w0, b0 = params[0]
    tail = params[1:]
    N0 = w0.shape[1]
    out_dim = tail[-1][0].shape[1]

    # --- pad M (sublanes) and K (so K % tk == 0; zero-padding is exact) ---
    tk = min(tk, _round_up(K, 128))
    Mp = max(8, _round_up(B, 8))
    Kp = _round_up(K, tk)
    x_p = jnp.zeros((Mp, Kp), weight_dtype).at[:B, :K].set(
        x_flat.astype(weight_dtype))
    w0_p = jnp.zeros((Kp, N0), weight_dtype).at[:K, :].set(
        w0.astype(weight_dtype))
    b0_p = b0.reshape(1, N0).astype(jnp.float32)

    # --- lane-dense output: pad last layer to a multiple of 128 columns ---
    out_pad = _round_up(max(out_dim, lane_pad), lane_pad)
    tail_flat = []
    for li, (w, b) in enumerate(tail):
        if li == len(tail) - 1:
            wp = jnp.zeros((w.shape[0], out_pad), weight_dtype)
            wp = wp.at[:, :out_dim].set(w.astype(weight_dtype))
            bp = jnp.zeros((1, out_pad), jnp.float32)
            bp = bp.at[:, :out_dim].set(b.astype(jnp.float32))
            tail_flat += [wp, bp]
        else:
            tail_flat += [w.astype(weight_dtype),
                          b.reshape(1, -1).astype(jnp.float32)]

    nk = Kp // tk

    in_specs = [
        pl.BlockSpec((Mp, tk), lambda k: (0, k)),   # activations: K tiles
        pl.BlockSpec((tk, N0), lambda k: (k, 0)),   # W0: streamed K tiles
        pl.BlockSpec((1, N0), lambda k: (0, 0)),    # b0: resident
    ]
    for arr in tail_flat:                            # small tail: resident
        in_specs.append(pl.BlockSpec(arr.shape, lambda k: (0, 0)))

    out_specs = pl.BlockSpec((Mp, out_pad), lambda k: (0, 0))

    flops = 2 * Mp * (Kp * N0 + sum(w.shape[0] * w.shape[1] for w, _ in tail))
    bytes_accessed = (
        x_p.size * x_p.dtype.itemsize
        + w0_p.size * w0_p.dtype.itemsize
        + sum(a.size * a.dtype.itemsize for a in tail_flat)
        + Mp * out_pad * 4
    )

    out = pl.pallas_call(
        _dense_head_kernel,
        out_shape=jax.ShapeDtypeStruct((Mp, out_pad), jnp.float32),
        grid_spec=pltpu.PrefetchScalarGridSpec(
            num_scalar_prefetch=0,
            grid=(nk,),
            in_specs=in_specs,
            out_specs=out_specs,
            scratch_shapes=[pltpu.VMEM((Mp, N0), jnp.float32)],
        ),
        compiler_params=pltpu.CompilerParams(
            dimension_semantics=("arbitrary",),        # K is a reduction axis
            vmem_limit_bytes=48 * 1024 * 1024,
        ),
        cost_estimate=pl.CostEstimate(
            flops=flops, transcendentals=0, bytes_accessed=bytes_accessed),
    )(x_p, w0_p, b0_p, *tail_flat)

    return out[:B, :out_dim]


def init_linear(key, fan_in, fan_out):
    """PyTorch-default-style uniform init, deterministic via PRNGKey."""
    kw, kb = jax.random.split(key)
    bound = 1.0 / float(fan_in) ** 0.5
    w = jax.random.uniform(kw, (fan_in, fan_out), jnp.float32, -bound, bound)
    b = jax.random.uniform(kb, (fan_out,), jnp.float32, -bound, bound)
    return w, b


if __name__ == "__main__":
    # Small shapes: seq=8, hidden=64 so the flattened dim is 8*64 = 512
    # (stand-in for the module's hard-coded 512*768 BERT flatten); tk=128
    # gives 4 K tiles so the streaming/accumulator path is exercised.
    B, S, E = 2, 8, 64
    VOCAB = 1000
    n_layers = 2
    output_dim = 10

    key = jax.random.PRNGKey(0)
    k_emb, k_x, k_p = jax.random.split(key, 3)

    # TODO(synk): the pretrained 12-layer 'bert-base-uncased' encoder cannot be
    # reproduced in-script; the frozen embedder is replaced by a frozen
    # deterministic token-embedding lookup producing (B, S, E).
    emb_table = 0.02 * jax.random.normal(k_emb, (VOCAB, E), jnp.float32)
    x_ids = jax.random.randint(k_x, (B, S), 0, VOCAB, dtype=jnp.int32)

    # Head layer sizes mirror the module after the flatten dim:
    # Linear(S*E, 512), n_layers x Linear(512, 512), Dropout(identity),
    # Linear(512, 256), Linear(256, 128), Linear(128, output_dim).
    sizes = [S * E, 512] + [512] * n_layers + [256, 128, output_dim]
    keys = jax.random.split(k_p, len(sizes) - 1)
    params = [init_linear(keys[i], sizes[i], sizes[i + 1])
              for i in range(len(sizes) - 1)]

    # --- glue (plain JAX): frozen embedding lookup + flatten ---
    embedded = emb_table[x_ids]            # (B, S, E)  -- FrozenBert substitute
    x_flat = embedded.reshape(B, S * E)    # nn.Flatten

    # --- hot path: K-tiled fused Linear stack in Pallas ---
    out = dense_head_pallas(x_flat, params, tk=128)
    out = jax.block_until_ready(out)

    # Pure-JAX reference with matching bf16 weight/activation rounding.
    def _bf(a):
        return a.astype(jnp.bfloat16).astype(jnp.float32)

    ref = jnp.dot(_bf(x_flat), _bf(params[0][0])) + params[0][1]
    for w, b in params[1:]:
        ref = jnp.dot(_bf(ref), _bf(w)) + b

    assert out.shape == (B, output_dim)
    assert jnp.allclose(out, ref, atol=1e-2, rtol=1e-2), "mismatch vs reference"

    print("KERNEL_OK")
</pallas_src>

<mosaic_0001>
module attributes {stable_mosaic.version = 11 : i64} {
  func.func @_dense_head_kernel(%arg0: i32, %arg1: memref<8x128xbf16, #tpu.memory_space<vmem>>, %arg2: memref<128x512xbf16, #tpu.memory_space<vmem>>, %arg3: memref<1x512xf32, #tpu.memory_space<vmem>>, %arg4: memref<512x512xbf16, #tpu.memory_space<vmem>>, %arg5: memref<1x512xf32, #tpu.memory_space<vmem>>, %arg6: memref<512x512xbf16, #tpu.memory_space<vmem>>, %arg7: memref<1x512xf32, #tpu.memory_space<vmem>>, %arg8: memref<512x256xbf16, #tpu.memory_space<vmem>>, %arg9: memref<1x256xf32, #tpu.memory_space<vmem>>, %arg10: memref<256x128xbf16, #tpu.memory_space<vmem>>, %arg11: memref<1x128xf32, #tpu.memory_space<vmem>>, %arg12: memref<128x128xbf16, #tpu.memory_space<vmem>>, %arg13: memref<1x128xf32, #tpu.memory_space<vmem>>, %arg14: memref<8x128xf32, #tpu.memory_space<vmem>>, %arg15: memref<8x512xf32, #tpu.memory_space<vmem>>) attributes {dimension_semantics = [#tpu.dimension_semantics<arbitrary>], iteration_bounds = array<i64: 4>, scalar_prefetch = 0 : i64, scratch_operands = 1 : i64, tpu.core_type = #tpu.core_type<tc>, window_params = [{transform_indices = @transform_0, window_bounds = array<i64: 8, 128>}, {transform_indices = @transform_1, window_bounds = array<i64: 128, 512>}, {pipeline_mode = #tpu.pipeline_mode<synchronous>, transform_indices = @transform_2, window_bounds = array<i64: 1, 512>}, {pipeline_mode = #tpu.pipeline_mode<synchronous>, transform_indices = @transform_3, window_bounds = array<i64: 512, 512>}, {pipeline_mode = #tpu.pipeline_mode<synchronous>, transform_indices = @transform_4, window_bounds = array<i64: 1, 512>}, {pipeline_mode = #tpu.pipeline_mode<synchronous>, transform_indices = @transform_5, window_bounds = array<i64: 512, 512>}, {pipeline_mode = #tpu.pipeline_mode<synchronous>, transform_indices = @transform_6, window_bounds = array<i64: 1, 512>}, {pipeline_mode = #tpu.pipeline_mode<synchronous>, transform_indices = @transform_7, window_bounds = array<i64: 512, 256>}, {pipeline_mode = #tpu.pipeline_mode<synchronous>, transform_indices = @transform_8, window_bounds = array<i64: 1, 256>}, {pipeline_mode = #tpu.pipeline_mode<synchronous>, transform_indices = @transform_9, window_bounds = array<i64: 256, 128>}, {pipeline_mode = #tpu.pipeline_mode<synchronous>, transform_indices = @transform_10, window_bounds = array<i64: 1, 128>}, {pipeline_mode = #tpu.pipeline_mode<synchronous>, transform_indices = @transform_11, window_bounds = array<i64: 128, 128>}, {pipeline_mode = #tpu.pipeline_mode<synchronous>, transform_indices = @transform_12, window_bounds = array<i64: 1, 128>}, {pipeline_mode = #tpu.pipeline_mode<synchronous>, transform_indices = @transform_13, window_bounds = array<i64: 8, 128>}]} {
    %c0_i32 = arith.constant 0 : i32
    %0 = arith.cmpi eq, %arg0, %c0_i32 : i32
    %1 = arith.extui %0 : i1 to i32
    %c0_i32_0 = arith.constant 0 : i32
    %2 = arith.cmpi ne, %1, %c0_i32_0 : i32
    scf.if %2 {
      %cst_9 = arith.constant 0.000000e+00 : f32
      %12 = vector.broadcast %cst_9 : f32 to vector<8x512xf32>
      %c0_10 = arith.constant 0 : index
      %c0_11 = arith.constant 0 : index
      %13 = vector.load %arg15[%c0_10, %c0_11] : memref<8x512xf32, #tpu.memory_space<vmem>>, vector<8x512xf32>
      tpu.vector_store %arg15[%c0_10, %c0_11], %12 {strides = array<i32>} : memref<8x512xf32, #tpu.memory_space<vmem>>, vector<8x512xf32>,
    } else {
    }
    %c0 = arith.constant 0 : index
    %c0_1 = arith.constant 0 : index
    %3 = vector.load %arg15[%c0, %c0_1] : memref<8x512xf32, #tpu.memory_space<vmem>>, vector<8x512xf32>
    %c0_2 = arith.constant 0 : index
    %c0_3 = arith.constant 0 : index
    %4 = vector.load %arg1[%c0_2, %c0_3] : memref<8x128xbf16, #tpu.memory_space<vmem>>, vector<8x128xbf16>
    %c0_4 = arith.constant 0 : index
    %c0_5 = arith.constant 0 : index
    %5 = vector.load %arg2[%c0_4, %c0_5] : memref<128x512xbf16, #tpu.memory_space<vmem>>, vector<128x512xbf16>
    %cst = arith.constant dense<0.000000e+00> : vector<8x512xf32>
    %6 = tpu.matmul %4, %5, %cst {dimension_numbers = #tpu.dot_dimension_numbers<[1], [0], [0], [1], [0, 0, 1, 1], [], []>} : vector<8x128xbf16>, vector<128x512xbf16>, vector<8x512xf32> -> vector<8x512xf32>
    %7 = arith.addf %3, %6 : vector<8x512xf32>
    %c0_6 = arith.constant 0 : index
    %c0_7 = arith.constant 0 : index
    %8 = vector.load %arg15[%c0_6, %c0_7] : memref<8x512xf32, #tpu.memory_space<vmem>>, vector<8x512xf32>
    tpu.vector_store %arg15[%c0_6, %c0_7], %7 {strides = array<i32>} : memref<8x512xf32, #tpu.memory_space<vmem>>, vector<8x512xf32>,
    %c3_i32 = arith.constant 3 : i32
    %9 = arith.cmpi eq, %arg0, %c3_i32 : i32
    %10 = arith.extui %9 : i1 to i32
    %c0_i32_8 = arith.constant 0 : i32
    %11 = arith.cmpi ne, %10, %c0_i32_8 : i32
    scf.if %11 {
      %c0_9 = arith.constant 0 : index
      %c0_10 = arith.constant 0 : index
      %12 = vector.load %arg15[%c0_9, %c0_10] : memref<8x512xf32, #tpu.memory_space<vmem>>, vector<8x512xf32>
      %c0_11 = arith.constant 0 : index
      %c0_12 = arith.constant 0 : index
      %13 = vector.load %arg3[%c0_11, %c0_12] : memref<1x512xf32, #tpu.memory_space<vmem>>, vector<1x512xf32>
      %14 = vector.broadcast %13 : vector<1x512xf32> to vector<8x512xf32>
      %15 = arith.addf %12, %14 : vector<8x512xf32>
      %c0_13 = arith.constant 0 : index
      %c0_14 = arith.constant 0 : index
      %16 = vector.load %arg4[%c0_13, %c0_14] : memref<512x512xbf16, #tpu.memory_space<vmem>>, vector<512x512xbf16>
      %c0_15 = arith.constant 0 : index
      %c0_16 = arith.constant 0 : index
      %17 = vector.load %arg5[%c0_15, %c0_16] : memref<1x512xf32, #tpu.memory_space<vmem>>, vector<1x512xf32>
      %18 = arith.truncf %15 : vector<8x512xf32> to vector<8x512xbf16>
      %cst_17 = arith.constant dense<0.000000e+00> : vector<8x512xf32>
      %19 = tpu.matmul %18, %16, %cst_17 {dimension_numbers = #tpu.dot_dimension_numbers<[1], [0], [0], [1], [0, 0, 1, 1], [], []>} : vector<8x512xbf16>, vector<512x512xbf16>, vector<8x512xf32> -> vector<8x512xf32>
      %20 = vector.broadcast %17 : vector<1x512xf32> to vector<8x512xf32>
      %21 = arith.addf %19, %20 : vector<8x512xf32>
      %c0_18 = arith.constant 0 : index
      %c0_19 = arith.constant 0 : index
      %22 = vector.load %arg6[%c0_18, %c0_19] : memref<512x512xbf16, #tpu.memory_space<vmem>>, vector<512x512xbf16>
      %c0_20 = arith.constant 0 : index
      %c0_21 = arith.constant 0 : index
      %23 = vector.load %arg7[%c0_20, %c0_21] : memref<1x512xf32, #tpu.memory_space<vmem>>, vector<1x512xf32>
      %24 = arith.truncf %21 : vector<8x512xf32> to vector<8x512xbf16>
      %cst_22 = arith.constant dense<0.000000e+00> : vector<8x512xf32>
      %25 = tpu.matmul %24, %22, %cst_22 {dimension_numbers = #tpu.dot_dimension_numbers<[1], [0], [0], [1], [0, 0, 1, 1], [], []>} : vector<8x512xbf16>, vector<512x512xbf16>, vector<8x512xf32> -> vector<8x512xf32>
      %26 = vector.broadcast %23 : vector<1x512xf32> to vector<8x512xf32>
      %27 = arith.addf %25, %26 : vector<8x512xf32>
      %c0_23 = arith.constant 0 : index
      %c0_24 = arith.constant 0 : index
      %28 = vector.load %arg8[%c0_23, %c0_24] : memref<512x256xbf16, #tpu.memory_space<vmem>>, vector<512x256xbf16>
      %c0_25 = arith.constant 0 : index
      %c0_26 = arith.constant 0 : index
      %29 = vector.load %arg9[%c0_25, %c0_26] : memref<1x256xf32, #tpu.memory_space<vmem>>, vector<1x256xf32>
      %30 = arith.truncf %27 : vector<8x512xf32> to vector<8x512xbf16>
      %cst_27 = arith.constant dense<0.000000e+00> : vector<8x256xf32>
      %31 = tpu.matmul %30, %28, %cst_27 {dimension_numbers = #tpu.dot_dimension_numbers<[1], [0], [0], [1], [0, 0, 1, 1], [], []>} : vector<8x512xbf16>, vector<512x256xbf16>, vector<8x256xf32> -> vector<8x256xf32>
      %32 = vector.broadcast %29 : vector<1x256xf32> to vector<8x256xf32>
      %33 = arith.addf %31, %32 : vector<8x256xf32>
      %c0_28 = arith.constant 0 : index
      %c0_29 = arith.constant 0 : index
      %34 = vector.load %arg10[%c0_28, %c0_29] : memref<256x128xbf16, #tpu.memory_space<vmem>>, vector<256x128xbf16>
      %c0_30 = arith.constant 0 : index
      %c0_31 = arith.constant 0 : index
      %35 = vector.load %arg11[%c0_30, %c0_31] : memref<1x128xf32, #tpu.memory_space<vmem>>, vector<1x128xf32>
      %36 = arith.truncf %33 : vector<8x256xf32> to vector<8x256xbf16>
      %cst_32 = arith.constant dense<0.000000e+00> : vector<8x128xf32>
      %37 = tpu.matmul %36, %34, %cst_32 {dimension_numbers = #tpu.dot_dimension_numbers<[1], [0], [0], [1], [0, 0, 1, 1], [], []>} : vector<8x256xbf16>, vector<256x128xbf16>, vector<8x128xf32> -> vector<8x128xf32>
      %38 = vector.broadcast %35 : vector<1x128xf32> to vector<8x128xf32>
      %39 = arith.addf %37, %38 : vector<8x128xf32>
      %c0_33 = arith.constant 0 : index
      %c0_34 = arith.constant 0 : index
      %40 = vector.load %arg12[%c0_33, %c0_34] : memref<128x128xbf16, #tpu.memory_space<vmem>>, vector<128x128xbf16>
      %c0_35 = arith.constant 0 : index
      %c0_36 = arith.constant 0 : index
      %41 = vector.load %arg13[%c0_35, %c0_36] : memref<1x128xf32, #tpu.memory_space<vmem>>, vector<1x128xf32>
      %42 = arith.truncf %39 : vector<8x128xf32> to vector<8x128xbf16>
      %cst_37 = arith.constant dense<0.000000e+00> : vector<8x128xf32>
      %43 = tpu.matmul %42, %40, %cst_37 {dimension_numbers = #tpu.dot_dimension_numbers<[1], [0], [0], [1], [0, 0, 1, 1], [], []>} : vector<8x128xbf16>, vector<128x128xbf16>, vector<8x128xf32> -> vector<8x128xf32>
      %44 = vector.broadcast %41 : vector<1x128xf32> to vector<8x128xf32>
      %45 = arith.addf %43, %44 : vector<8x128xf32>
      %c0_38 = arith.constant 0 : index
      %c0_39 = arith.constant 0 : index
      %46 = vector.load %arg14[%c0_38, %c0_39] : memref<8x128xf32, #tpu.memory_space<vmem>>, vector<8x128xf32>
      tpu.vector_store %arg14[%c0_38, %c0_39], %45 {strides = array<i32>} : memref<8x128xf32, #tpu.memory_space<vmem>>, vector<8x128xf32>,
    } else {
    }
    return
  }
  func.func @transform_0(%arg0: i32) -> (i32, i32) {
    %c0_i32 = arith.constant 0 : i32
    %c0_i32_0 = arith.constant 0 : i32
    return %c0_i32, %arg0 : i32, i32
  }
  func.func @transform_1(%arg0: i32) -> (i32, i32) {
    %c0_i32 = arith.constant 0 : i32
    %c0_i32_0 = arith.constant 0 : i32
    return %arg0, %c0_i32 : i32, i32
  }
  func.func @transform_2(%arg0: i32) -> (i32, i32) {
    %c0_i32 = arith.constant 0 : i32
    %c0_i32_0 = arith.constant 0 : i32
    %c0_i32_1 = arith.constant 0 : i32
    return %c0_i32, %c0_i32_0 : i32, i32
  }
  func.func @transform_3(%arg0: i32) -> (i32, i32) {
    %c0_i32 = arith.constant 0 : i32
    %c0_i32_0 = arith.constant 0 : i32
    %c0_i32_1 = arith.constant 0 : i32
    return %c0_i32, %c0_i32_0 : i32, i32
  }
  func.func @transform_4(%arg0: i32) -> (i32, i32) {
    %c0_i32 = arith.constant 0 : i32
    %c0_i32_0 = arith.constant 0 : i32
    %c0_i32_1 = arith.constant 0 : i32
    return %c0_i32, %c0_i32_0 : i32, i32
  }
  func.func @transform_5(%arg0: i32) -> (i32, i32) {
    %c0_i32 = arith.constant 0 : i32
    %c0_i32_0 = arith.constant 0 : i32
    %c0_i32_1 = arith.constant 0 : i32
    return %c0_i32, %c0_i32_0 : i32, i32
  }
  func.func @transform_6(%arg0: i32) -> (i32, i32) {
    %c0_i32 = arith.constant 0 : i32
    %c0_i32_0 = arith.constant 0 : i32
    %c0_i32_1 = arith.constant 0 : i32
    return %c0_i32, %c0_i32_0 : i32, i32
  }
  func.func @transform_7(%arg0: i32) -> (i32, i32) {
    %c0_i32 = arith.constant 0 : i32
    %c0_i32_0 = arith.constant 0 : i32
    %c0_i32_1 = arith.constant 0 : i32
    return %c0_i32, %c0_i32_0 : i32, i32
  }
  func.func @transform_8(%arg0: i32) -> (i32, i32) {
    %c0_i32 = arith.constant 0 : i32
    %c0_i32_0 = arith.constant 0 : i32
    %c0_i32_1 = arith.constant 0 : i32
    return %c0_i32, %c0_i32_0 : i32, i32
  }
  func.func @transform_9(%arg0: i32) -> (i32, i32) {
    %c0_i32 = arith.constant 0 : i32
    %c0_i32_0 = arith.constant 0 : i32
    %c0_i32_1 = arith.constant 0 : i32
    return %c0_i32, %c0_i32_0 : i32, i32
  }
  func.func @transform_10(%arg0: i32) -> (i32, i32) {
    %c0_i32 = arith.constant 0 : i32
    %c0_i32_0 = arith.constant 0 : i32
    %c0_i32_1 = arith.constant 0 : i32
    return %c0_i32, %c0_i32_0 : i32, i32
  }
  func.func @transform_11(%arg0: i32) -> (i32, i32) {
    %c0_i32 = arith.constant 0 : i32
    %c0_i32_0 = arith.constant 0 : i32
    %c0_i32_1 = arith.constant 0 : i32
    return %c0_i32, %c0_i32_0 : i32, i32
  }
  func.func @transform_12(%arg0: i32) -> (i32, i32) {
    %c0_i32 = arith.constant 0 : i32
    %c0_i32_0 = arith.constant 0 : i32
    %c0_i32_1 = arith.constant 0 : i32
    return %c0_i32, %c0_i32_0 : i32, i32
  }
  func.func @transform_13(%arg0: i32) -> (i32, i32) {
    %c0_i32 = arith.constant 0 : i32
    %c0_i32_0 = arith.constant 0 : i32
    %c0_i32_1 = arith.constant 0 : i32
    return %c0_i32, %c0_i32_0 : i32, i32
  }
}

</mosaic_0001>

<bundles_post_ra>
// kernel: tpu_custom_call.1
= control target key start
LH: loop header
LB: loop body
LE: loop exit
PB: predicated region body
PF: predicated region fallthrough
CT: control target
= control target key end

     0   :  { %s5670_s0 = inlined_call_operand.hbm [shape: bf16[8,512], index: 0, kind: input, shape index: {}]   ;;  %s5671_s1 = inlined_call_operand.hbm [shape: bf16[512,512], index: 1, kind: input, shape index: {}]   ;;  %s5672_s2 = inlined_call_operand.vmem [shape: f32[1,512], index: 2, kind: input, shape index: {}]   ;;  %s5673_s3 = inlined_call_operand.hbm [shape: bf16[512,512], index: 3, kind: input, shape index: {}]   ;;  %s5674_s4 = inlined_call_operand.vmem [shape: f32[1,512], index: 4, kind: input, shape index: {}]   ;;  %s5675_s5 = inlined_call_operand.hbm [shape: bf16[512,512], index: 5, kind: input, shape index: {}]   ;;  %s5676_s6 = inlined_call_operand.vmem [shape: f32[1,512], index: 6, kind: input, shape index: {}]   ;;  %s5677_s7 = inlined_call_operand.hbm [shape: bf16[512,256], index: 7, kind: input, shape index: {}]   ;;  %s5678_s8 = inlined_call_operand.vmem [shape: f32[1,256], index: 8, kind: input, shape index: {}]   ;;  %s5679_s9 = inlined_call_operand.hbm [shape: bf16[256,128], index: 9, kind: input, shape index: {}]   ;;  %s5680_s10 = inlined_call_operand.vmem [shape: f32[1,128], index: 10, kind: input, shape index: {}]   ;;  %s5681_s11 = inlined_call_operand.hbm [shape: bf16[128,128], index: 11, kind: input, shape index: {}]   ;;  %s5682_s12 = inlined_call_operand.vmem [shape: f32[1,128], index: 12, kind: input, shape index: {}]   ;;  %s5683_s13 = inlined_call_operand.hbm [shape: f32[8,128], index: 13, kind: output, shape index: {}]  }
   0x1   :  { %5691 = sst [smem:[#allocation22_spill]] %s5670_s0 }
   0x2   :  { %5692 = sst [smem:[#allocation23_spill]] %s5676_s6 }
   0x3   :  { %5693 = sst [smem:[#allocation24_spill]] %s5678_s8 }
   0x4   :  { %5694 = sst [smem:[#allocation25_spill]] %s5680_s10 }
   0x5   :  { %5695 = sst [smem:[#allocation26_spill]] %s5682_s12 }
   0x6   :  { %5696 = sst [smem:[#allocation27_spill]] %s5683_s13 }
   0x7   :  { %18 = vsyncpa [#allocation4], 0 }
   0x8   :  { %20 = vsyncpa [#allocation4 + $0x1], 0 }
   0x9   :  { %21 = vsyncpa [#allocation7], 0 }
   0xa   :  { %23 = vsyncpa [#allocation7 + $0x1], 0 }
   0xb   :  { %24 = vsyncpa [#allocation10], 0 }
   0xc   :  { %25 = vsyncpa [#allocation13], 0 }
   0xd   :  { %26 = vsyncpa [#allocation5], 0  ;;  %s5226_s25 = smov 0   ;;  %s5228_s26 = smov 0  }
   0xe   :  { %s5230_s27 = smov 0   ;;  %s5232_s28 = smov 0  }
   0xf LB: > { %s5138_s29 = smov [#allocation8]   ;;  %s5247_s14 = sadd.s32 4294967295, %s5136_s28   ;;  %s5136_s28 = sphi %s5232_s28, %s5724_s28   ;;  %s5132_s27 = sphi %s5230_s27, %s5723_s27   ;;  %s5128_s26 = sphi %s5228_s26, %s5722_s26   ;;  %s5124_s25 = sphi %s5226_s25, %s5721_s25  }
  0x10   : > { %s356_s30 = sshll.u32 %s5138_s29, 4  ;;  %p3704_p0 = scmp.ge.s32.totalorder %s5136_s28, 1  ;;  %s5253_s30 = int_to_ptr.vmem [resolvable:$true] %s356_s30 }
  0x11   : > { %p5687_p1 = scmp.eq.s32.totalorder %s5247_s14, 0  ;;  %p341_p2 = scmp.lt.s32.totalorder %s5136_s28, 5 }
  0x12   : > { %s5139_s16 = smov [#allocation9]   ;;  %s5140_s19 = smov [#allocation12]  }
  0x13   : > { %p5255_p4 = pnand %p3704_p0, %p341_p2  ;;  %s372_s17 = sshll.u32 %s5139_s16, 4  ;;  %s5267_s17 = int_to_ptr.vmem [resolvable:$true] %s372_s17 }
  0x14   : > { %s404_s20 = sshll.u32 %s5140_s19, 4  ;;  %s4856_s23 = scalar_lea.hbm %s5673_s3, 16384  ;;  %s5269_s20 = int_to_ptr.vmem [resolvable:$true] %s404_s20 }
  0x15   : > { %s5697_s15 = scalar_select %p5255_p4, 1, 0 }
  0x16   : > { %p4220_p5 = pneg %p5255_p4  ;;  %p4857_p7 = scmp.ne.s32.totalorder %s5673_s3, %s4856_s23 }
  0x17   : > { %p4863_p11 = scmp.lt.u32.totalorder %s4856_s23, %s5673_s3 }
  0x18   : > { %p5263_p6 = pnand %p4220_p5, %p5687_p1 }
  0x1a   : > { %p5279_p8 = pneg %p5263_p6 }
  0x1c   : > { %p4859_p9 = pnand %p5279_p8, %p4857_p7 }
  0x1e   : > { %p4860_p10 = pneg %p4859_p9 }
  0x20   : > { %p4865_p12 = pnand %p4863_p11, %p4860_p10 }
  0x22   : > { %4868 = shalt.err (!%p4865_p12)
}
  0x23   : > { %s4869_s21 = scalar_lea.vmem %s5253_s30, 16384  ;;  %p4877_p5 = scmp.lt.s32.totalorder %s5253_s30, %s5253_s30 }
  0x24   : > { %p4870_p13 = scmp.ne.s32.totalorder %s5253_s30, %s4869_s21  ;;  %p4878_p3 = scmp.lt.s32.totalorder %s4869_s21, %s4869_s21 }
  0x26   : > { %p4872_p0 = pnand %p4870_p13, %p5279_p8  ;;  %p4879_p7 = por %p4878_p3, %p4877_p5 }
  0x28   : > { %p4873_p2 = pneg %p4872_p0 }
  0x2a   : > { %p4880_p9 = pnand %p4879_p7, %p4873_p2 }
  0x2c   : > { %4883 = shalt.err (!%p4880_p9)
}
  0x2d   : > { %s5685_s22 = smov 256   ;;  %s5686_s13 = smov 16  }
  0x2e   : > { %4223 = dma.hbm_to_vmem [thread:$0]  (!%p5263_p6), %s5673_s3, 16384, %s5253_s30, [#allocation7], %s5685_s22, %s5685_s22, %s5686_s13  }
  0x2f   : > { %s4884_s21 = scalar_lea.hbm %s5675_s5, 16384 }
  0x30   : > { %p4885_p3 = scmp.ne.s32.totalorder %s5675_s5, %s4884_s21  ;;  %p4891_p12 = scmp.lt.u32.totalorder %s4884_s21, %s5675_s5 }
  0x32   : > { %p4887_p10 = pnand %p4885_p3, %p5279_p8 }
  0x34   : > { %p4888_p11 = pneg %p4887_p10 }
  0x36   : > { %p4893_p13 = pnand %p4891_p12, %p4888_p11 }
  0x38   : > { %4896 = shalt.err (!%p4893_p13)
}
  0x39   : > { %s4897_s30 = scalar_lea.vmem %s5267_s17, 16384  ;;  %p4905_p7 = scmp.lt.s32.totalorder %s5267_s17, %s5267_s17 }
  0x3a   : > { %p4898_p0 = scmp.ne.s32.totalorder %s5267_s17, %s4897_s30  ;;  %p4906_p9 = scmp.lt.s32.totalorder %s4897_s30, %s4897_s30 }
  0x3c   : > { %p4900_p2 = pnand %p4898_p0, %p5279_p8  ;;  %p4907_p3 = por %p4906_p9, %p4905_p7 }
  0x3e   : > { %p4901_p5 = pneg %p4900_p2 }
  0x40   : > { %p4908_p10 = pnand %p4907_p3, %p4901_p5 }
  0x42   : > { %4911 = shalt.err (!%p4908_p10)
}
  0x43   : > { %4226 = dma.hbm_to_vmem [thread:$0]  (!%p5263_p6), %s5675_s5, 16384, %s5267_s17, [#allocation10], %s5685_s22, %s5685_s22, %s5686_s13  }
  0x44   : > { %s4912_s23 = scalar_lea.hbm %s5679_s9, 2048 }
  0x45   : > { %p4913_p11 = scmp.ne.s32.totalorder %s5679_s9, %s4912_s23  ;;  %p4919_p0 = scmp.lt.u32.totalorder %s4912_s23, %s5679_s9 }
  0x47   : > { %p4915_p12 = pnand %p4913_p11, %p5279_p8 }
  0x49   : > { %p4916_p13 = pneg %p4915_p12 }
  0x4b   : > { %p4921_p2 = pnand %p4919_p0, %p4916_p13 }
  0x4d   : > { %4924 = shalt.err (!%p4921_p2)
}
  0x4e   : > { %s4925_s17 = scalar_lea.vmem %s5269_s20, 2048  ;;  %p4933_p3 = scmp.lt.s32.totalorder %s5269_s20, %s5269_s20 }
  0x4f   : > { %p4926_p5 = scmp.ne.s32.totalorder %s5269_s20, %s4925_s17  ;;  %p4934_p10 = scmp.lt.s32.totalorder %s4925_s17, %s4925_s17 }
  0x51   : > { %p4928_p7 = pnand %p4926_p5, %p5279_p8  ;;  %p4935_p11 = por %p4934_p10, %p4933_p3 }
  0x53   : > { %p4929_p9 = pneg %p4928_p7 }
  0x55   : > { %p4936_p12 = pnand %p4935_p11, %p4929_p9 }
  0x57   : > { %4939 = shalt.err (!%p4936_p12)
}
  0x58   : > { %s5689_s30 = smov 64   ;;  %s5690_s6 = smov 4  }
  0x59   : > { %4232 = dma.hbm_to_vmem [thread:$0]  (!%p5263_p6), %s5679_s9, 2048, %s5269_s20, [#allocation13], %s5689_s30, %s5689_s30, %s5690_s6  }
  0x5a   : > { %s5145_s12 = smov [#allocation11]   ;;  %s4940_s19 = scalar_lea.hbm %s5677_s7, 8192 }
  0x5b   : > { %s388_s23 = sshll.u32 %s5145_s12, 4  ;;  %p4941_p13 = scmp.ne.s32.totalorder %s5677_s7, %s4940_s19  ;;  %s389_s23 = int_to_ptr.vmem [resolvable:$true] %s388_s23 }
  0x5c   : > { %p4947_p5 = scmp.lt.u32.totalorder %s4940_s19, %s5677_s7 }
  0x5d   : > { %p4943_p0 = pnand %p4941_p13, %p5279_p8 }
  0x5f   : > { %p4944_p2 = pneg %p4943_p0 }
  0x61   : > { %p4949_p7 = pnand %p4947_p5, %p4944_p2 }
  0x63   : > { %4952 = shalt.err (!%p4949_p7)
}
  0x64   : > { %s4953_s20 = scalar_lea.vmem %s389_s23, 8192  ;;  %p4961_p11 = scmp.lt.s32.totalorder %s389_s23, %s389_s23 }
  0x65   : > { %p4954_p9 = scmp.ne.s32.totalorder %s389_s23, %s4953_s20  ;;  %p4962_p12 = scmp.lt.s32.totalorder %s4953_s20, %s4953_s20 }
  0x67   : > { %p4956_p3 = pnand %p4954_p9, %p5279_p8  ;;  %p4963_p1 = por %p4962_p12, %p4961_p11 }
  0x69   : > { %p4957_p10 = pneg %p4956_p3 }
  0x6b   : > { %p4964_p4 = pnand %p4963_p1, %p4957_p10 }
  0x6d   : > { %4967 = shalt.err (!%p4964_p4)
}
  0x6e   : > { %s5146_s8 = smov 128   ;;  %s5147_s10 = smov 8  }
  0x6f   : > { %4229 = dma.hbm_to_vmem [thread:$0]  (!%p5263_p6), %s5677_s7, 8192, %s389_s23, [#allocation10], %s5146_s8, %s5146_s8, %s5147_s10  }
  0x70   : > { %s5148_s12 = smov [#allocation14]   ;;  %s4968_s21 = scalar_lea.hbm %s5681_s11, 1024 }
  0x71   : > { %s420_s24 = sshll.u32 %s5148_s12, 4  ;;  %p4969_p1 = scmp.ne.s32.totalorder %s5681_s11, %s4968_s21  ;;  %s421_s24 = int_to_ptr.vmem [resolvable:$true] %s420_s24 }
  0x72   : > { %p4975_p0 = scmp.lt.u32.totalorder %s4968_s21, %s5681_s11 }
  0x73   : > { %p4971_p4 = pnand %p4969_p1, %p5279_p8 }
  0x75   : > { %p4972_p13 = pneg %p4971_p4 }
  0x77   : > { %p4977_p2 = pnand %p4975_p0, %p4972_p13 }
  0x79   : > { %4980 = shalt.err (!%p4977_p2)
}
  0x7a   : > { %s4981_s23 = scalar_lea.vmem %s421_s24, 1024  ;;  %p4989_p3 = scmp.lt.s32.totalorder %s421_s24, %s421_s24 }
  0x7b   : > { %p4982_p5 = scmp.ne.s32.totalorder %s421_s24, %s4981_s23  ;;  %p4990_p10 = scmp.lt.s32.totalorder %s4981_s23, %s4981_s23 }
  0x7d   : > { %p4984_p7 = pnand %p4982_p5, %p5279_p8  ;;  %p4991_p11 = por %p4990_p10, %p4989_p3 }
  0x7f   : > { %p4985_p9 = pneg %p4984_p7 }
  0x81   : > { %p4992_p12 = pnand %p4991_p11, %p4985_p9 }
  0x83   : > { %4995 = shalt.err (!%p4992_p12)
}
  0x84   : > { %s5700_s8 = smov 4   ;;  %s5701_s10 = smov 64  }
  0x85   : > { %4235 = dma.hbm_to_vmem [thread:$0]  (!%p5263_p6), %s5681_s11, 1024, %s421_s24, [#allocation13], %s5701_s10, %s5701_s10, %s5700_s8  }
  0x86   : > { %s5395_s18 = sadd.s32 1, %s5136_s28   ;;  %s39_s22 = sadd.s32 1, %s5132_s27 }
  0x87   : > { %s36_s16 = ssub.s32 %s5136_s28, %s5395_s18  ;;  %p46_p1 = scmp.ne.s32.totalorder %s5132_s27, %s5128_s26 }
  0x88   : > { %p37_p8 = scmp.eq.s32.totalorder %s36_s16, 0  ;;  %p47_p4 = scmp.eq.s32.totalorder %s5136_s28, 0 }
  0x89   : > { %p52_p13 = scmp.ne.s32.totalorder %s5128_s26, %s5124_s25  ;;  %p5702_p2 = scmp.eq.s32.totalorder %s5247_s14, 0 }
  0x8a   : > { %s5406_s13 = scalar_select %p37_p8, %s5132_s27, %s39_s22  }
  0x8b   : > { %p48_p0 = por %p47_p4, %p46_p1  ;;  %p5410_p5 = por %p5702_p2, %p52_p13 }
  0x8c   : > { %p4248_p7 = scmp.lt.s32.totalorder %s5136_s28, 4  ;;  %s5416_s24 = sand.u32 1, %s5132_s27  }
  0x8d   : > { %s3711_s29 = sshll.u32 %s5416_s24, 2  ;;  %s3712_s19 = sshll.u32 %s5136_s28, 6 }
  0x8e   : > { %s5704_s0 = sld [smem:[#allocation22_spill]]  ;;  %s441_s20 = scalar_lea.vmem [#allocation3], %s3711_s29 }
  0x8f   : > { %s448_s23 = sshll.u32 %s441_s20, 4  ;;  %p5427_p6 = pnand %p4248_p7, %p48_p0  ;;  %s5425_s23 = int_to_ptr.vmem [resolvable:$true] %s448_s23 }
  0x90   : > { %s3713_s10 = sshll.u32 %s5416_s24, 8  ;;  %s455_s30 = sand.u32 1, %s5136_s28  }
  0x91   : > { %s438_s6 = scalar_lea.sflag [#allocation4], %s5416_s24  ;;  %p4998_p3 = pneg %p5427_p6 }
  0x94   : > { %s5423_s25 = scalar_lea.hbm %s5704_s0, %s3712_s19  ;;  %s5001_s19 = scalar_lea.hbm %s5704_s0, 256 }
  0x95   : > { %s4996_s16 = scalar_lea.hbm %s5423_s25, 64  ;;  %p5002_p12 = scmp.lt.u32.totalorder %s5423_s25, %s5704_s0 }
  0x96   : > { %p4997_p9 = scmp.ne.s32.totalorder %s5423_s25, %s4996_s16  ;;  %p5003_p8 = scmp.lt.u32.totalorder %s5001_s19, %s4996_s16 }
  0x97   : > { %p5005_p4 = scmp.lt.u32.totalorder %s4996_s16, %s5423_s25 }
  0x98   : > { %p4999_p10 = pnand %p4998_p3, %p4997_p9  ;;  %p5004_p1 = por %p5003_p8, %p5002_p12 }
  0x9a   : > { %p5000_p11 = pneg %p4999_p10  ;;  %p5006_p13 = por %p5005_p4, %p5004_p1 }
  0x9c   : > { %p5007_p0 = pnand %p5006_p13, %p5000_p11 }
  0x9e   : > { %5010 = shalt.err (!%p5007_p0)
}
  0x9f   : > { %s5011_s20 = scalar_lea.vmem %s5425_s23, 64  ;;  %s5149_s22 = smov [#allocation3]  }
  0xa0   : > { %p5012_p2 = scmp.ne.s32.totalorder %s5425_s23, %s5011_s20  ;;  %s5016_s29 = sshll.u32 %s5149_s22, 4  ;;  %s5017_s29 = int_to_ptr.vmem [resolvable:$false] %s5016_s29 }
  0xa1   : > { %s5018_s21 = scalar_lea.vmem %s5017_s29, 128  ;;  %p5019_p10 = scmp.lt.s32.totalorder %s5425_s23, %s5017_s29 }
  0xa2   : > { %p5014_p7 = pnand %p5012_p2, %p4998_p3  ;;  %p5020_p12 = scmp.lt.s32.totalorder %s5018_s21, %s5011_s20 }
  0xa4   : > { %p5015_p9 = pneg %p5014_p7  ;;  %p5021_p8 = por %p5020_p12, %p5019_p10 }
  0xa6   : > { %p5022_p1 = pnand %p5021_p8, %p5015_p9 }
  0xa8   : > { %5025 = shalt.err (!%p5022_p1)
}
  0xa9   : > { %4239 = dma.hbm_to_vmem [thread:$0]  (!%p5427_p6), %s5423_s25, 64, %s5425_s23, %s438_s6  }
  0xaa   : > { %s459_s16 = scalar_lea.vmem [#allocation6], %s3713_s10  ;;  %s4110_s17 = sshll.u32 %s5136_s28, 12 }
  0xab   : > { %s467_s19 = sshll.u32 %s459_s16, 4  ;;  %s5467_s29 = scalar_lea.hbm %s5671_s1, %s4110_s17  ;;  %s5461_s19 = int_to_ptr.vmem [resolvable:$true] %s467_s19 }
  0xac   : > { %s5471_s21 = scalar_lea.sflag [#allocation7], %s455_s30  ;;  %s5026_s0 = scalar_lea.hbm %s5467_s29, 4096 }
  0xad   : > { %p5027_p11 = scmp.ne.s32.totalorder %s5467_s29, %s5026_s0  ;;  %s5031_s23 = scalar_lea.hbm %s5671_s1, 16384 }
  0xae   : > { %p5032_p0 = scmp.lt.u32.totalorder %s5467_s29, %s5671_s1  ;;  %p5033_p2 = scmp.lt.u32.totalorder %s5031_s23, %s5026_s0 }
  0xaf   : > { %p5029_p4 = pnand %p5027_p11, %p4998_p3  ;;  %p5035_p9 = scmp.lt.u32.totalorder %s5026_s0, %s5467_s29 }
  0xb0   : > { %p5034_p7 = por %p5033_p2, %p5032_p0 }
  0xb1   : > { %p5030_p13 = pneg %p5029_p4 }
  0xb2   : > { %p5036_p10 = por %p5035_p9, %p5034_p7 }
  0xb4   : > { %p5037_p12 = pnand %p5036_p10, %p5030_p13 }
  0xb6   : > { %5040 = shalt.err (!%p5037_p12)
}
  0xb7   : > { %s5041_s28 = scalar_lea.vmem %s5461_s19, 4096  ;;  %s5150_s30 = smov [#allocation6]  }
  0xb8   : > { %p5042_p8 = scmp.ne.s32.totalorder %s5461_s19, %s5041_s28  ;;  %s5046_s16 = sshll.u32 %s5150_s30, 4  ;;  %s5047_s16 = int_to_ptr.vmem [resolvable:$false] %s5046_s16 }
  0xb9   : > { %s5048_s17 = scalar_lea.vmem %s5047_s16, 8192  ;;  %p5049_p4 = scmp.lt.s32.totalorder %s5461_s19, %s5047_s16 }
  0xba   : > { %p5044_p1 = pnand %p5042_p8, %p4998_p3  ;;  %p5050_p0 = scmp.lt.s32.totalorder %s5048_s17, %s5041_s28 }
  0xbc   : > { %p5045_p11 = pneg %p5044_p1  ;;  %p5051_p2 = por %p5050_p0, %p5049_p4 }
  0xbe   : > { %p5052_p7 = pnand %p5051_p2, %p5045_p11 }
  0xc0   : > { %5055 = shalt.err (!%p5052_p7)
}
  0xc1   : > { %s5706_s0 = smov 16   ;;  %s5707_s22 = smov 256  }
  0xc2   : > { %4242 = dma.hbm_to_vmem [thread:$0]  (!%p5427_p6), %s5467_s29, 4096, %s5461_s19, %s5471_s21, %s5707_s22, %s5707_s22, %s5706_s0  }
  0xc3   : > { %p5708_p3 = scmp.ne.s32.totalorder %s5697_s15, 0 }
  0xc4   : > { %s481_s20 = sand.u32 (!%p5708_p3), 1, %s5128_s26  }
  0xc5   : > { %479 = sbr.rel (%p5708_p3) target bundleno = 1804 (0x70c), region = 72  ;;  %s3718_s24 = sshll.u32 (!%p5708_p3), %s481_s20, 2 }
  0xc6   : > { %s482_s25 = scalar_lea.sflag (!%p5708_p3), [#allocation4], %s481_s20  ;;  %s5503_s23 = scalar_lea.vmem (!%p5708_p3), [#allocation3], %s3718_s24 }
  0xcc   : > { %5099 = dma.done.wait (%p5410_p5), %s482_s25, 64  }
  0xcd   : > { %5101 = vsyncadd (%p5410_p5), %s482_s25, 4294967232  ;;  %s490_s8 = sand.u32 1, %s5247_s14   ;;  %s3719_s10 = sshll.u32 %s481_s20, 8 }
  0xce   : > { %s491_s19 = scalar_lea.sflag [#allocation7], %s490_s8  ;;  %s5510_s29 = scalar_lea.vmem [#allocation6], %s3719_s10 }
  0xcf   : > { %5103 = dma.done.wait (%p5410_p5), %s491_s19, 4096  }
  0xd0   : > { %5105 = vsyncadd (%p5410_p5), %s491_s19, 4294963200  ;;  %p5709_p6 = scmp.eq.s32.totalorder %s5247_s14, 0 }
  0xd2   : > { %5107 = dma.done.wait (%p5709_p6), [#allocation7], 16384   ;;  %p5710_p13 = pmov %p5709_p6 }
  0xd3   : > { %p5711_p9 = pmov %p5709_p6 }
  0xd4   : > { %5109 = vsyncadd (%p5710_p13), [#allocation7], 4294950912 }
  0xd5   : > { %5111 = dma.done.wait (%p5711_p9), [#allocation10], 24576   ;;  %p5712_p10 = pmov %p5709_p6 }
  0xd6   : > { %p5713_p12 = pmov %p5709_p6 }
  0xd7   : > { %5113 = vsyncadd (%p5712_p10), [#allocation10], 4294942720 }
  0xd8   : > { %5115 = dma.done.wait (%p5713_p12), [#allocation13], 3072   ;;  %p5714_p8 = pmov %p5709_p6 }
  0xd9   : > { %p5715_p5 = scmp.ne.s32.totalorder %s5247_s14, 0 }
  0xda   : > { %5117 = vsyncadd (%p5714_p8), [#allocation13], 4294964224  ;;  %v5151_v0 = vmov (!%p5715_p5), 0.0  }
  0xdb   : > { %562 = sbr.rel (%p5715_p5) target bundleno = 226 (0xe2), region = 104  ;;  %563 = vst [vmem:[#allocation2] sm:$0xff] (!%p5715_p5), %v5151_v0  ;;  %564 = vst [vmem:[#allocation2 + $0x8] sm:$0xff] (!%p5715_p5), %v5151_v0 }
  0xdc   : > { %565 = vst [vmem:[#allocation2 + $0x10] sm:$0xff] (!%p5715_p5), %v5151_v0  ;;  %566 = vst [vmem:[#allocation2 + $0x18] sm:$0xff] (!%p5715_p5), %v5151_v0 }
  0xe2 PF: > { %v4304_v1 = vld [vmem:[%s5510_s29 + $0x4] ss:$16 sps:$4 sm:$0xff]   ;;  %v4306_v2 = vld [vmem:[%s5510_s29 + $0xc] ss:$16 sps:$4 sm:$0xff]   ;;  %v5152_v3 = vmov 0   ;;  %p3758_p1 = scmp.ne.s32.totalorder %s5247_s14, 3 }
  0xe3   : > { %796 = vmatprep.mubr.bf16.mxu0 %v5152_v3  ;;  %837 = vmatprep.mubr.bf16.mxu1 %v5152_v3  ;;  %v4308_v4 = vld [vmem:[%s5510_s29] ss:$16 sps:$4 sm:$0xff]   ;;  %v4309_v5 = vld [vmem:[%s5510_s29 + $0x8] ss:$16 sps:$4 sm:$0xff]   ;;  %v4310_v6 = vld [vmem:[%s5510_s29 + $0x24] ss:$16 sps:$4 sm:$0xff]  }
  0xe4   : > { %764 = vmatprep.subr.bf16.mxu0 %v4304_v1  ;;  %805 = vmatprep.subr.bf16.mxu1 %v4306_v2  ;;  %v4312_v7 = vld [vmem:[%s5510_s29 + $0x2c] ss:$16 sps:$4 sm:$0xff]   ;;  %v4314_v8 = vld [vmem:[%s5510_s29 + $0x20] ss:$16 sps:$4 sm:$0xff]   ;;  %v4315_v9 = vld [vmem:[%s5510_s29 + $0x28] ss:$16 sps:$4 sm:$0xff]  }
  0xe5   : > { %765 = vmatpush1.bf16.msra.mxu0 %v4308_v4  ;;  %806 = vmatpush1.bf16.msra.mxu1 %v4309_v5  ;;  %v4316_v10 = vld [vmem:[%s5510_s29 + $0x44] ss:$16 sps:$4 sm:$0xff]   ;;  %v4318_v11 = vld [vmem:[%s5510_s29 + $0x4c] ss:$16 sps:$4 sm:$0xff]   ;;  %v4320_v12 = vld [vmem:[%s5510_s29 + $0x40] ss:$16 sps:$4 sm:$0xff]  }
  0xe6   : > { %766 = vmatprep.subr.bf16.mxu0 %v4310_v6  ;;  %807 = vmatprep.subr.bf16.mxu1 %v4312_v7  ;;  %v4321_v13 = vld [vmem:[%s5510_s29 + $0x48] ss:$16 sps:$4 sm:$0xff]   ;;  %v4322_v14 = vld [vmem:[%s5510_s29 + $0x64] ss:$16 sps:$4 sm:$0xff]   ;;  %v4324_v15 = vld [vmem:[%s5510_s29 + $0x6c] ss:$16 sps:$4 sm:$0xff]  }
  0xe7   : > { %v4326_v16 = vld [vmem:[%s5510_s29 + $0x60] ss:$16 sps:$4 sm:$0xff]   ;;  %v4327_v17 = vld [vmem:[%s5510_s29 + $0x68] ss:$16 sps:$4 sm:$0xff]   ;;  %v4328_v18 = vld [vmem:[%s5510_s29 + $0x84] ss:$16 sps:$4 sm:$0xff]  }
  0xe8   : > { %v4330_v19 = vld [vmem:[%s5510_s29 + $0x8c] ss:$16 sps:$4 sm:$0xff]   ;;  %v4332_v20 = vld [vmem:[%s5510_s29 + $0x80] ss:$16 sps:$4 sm:$0xff]   ;;  %v4333_v21 = vld [vmem:[%s5510_s29 + $0x88] ss:$16 sps:$4 sm:$0xff]  }
  0xe9   : > { %767 = vmatpush1.bf16.msra.mxu0 %v4314_v8  ;;  %808 = vmatpush1.bf16.msra.mxu1 %v4315_v9  ;;  %v4334_v22 = vld [vmem:[%s5510_s29 + $0xa4] ss:$16 sps:$4 sm:$0xff]   ;;  %v4336_v23 = vld [vmem:[%s5510_s29 + $0xac] ss:$16 sps:$4 sm:$0xff]   ;;  %v4338_v24 = vld [vmem:[%s5510_s29 + $0xa0] ss:$16 sps:$4 sm:$0xff]  }
  0xea   : > { %768 = vmatprep.subr.bf16.mxu0 %v4316_v10  ;;  %809 = vmatprep.subr.bf16.mxu1 %v4318_v11  ;;  %v4339_v25 = vld [vmem:[%s5510_s29 + $0xa8] ss:$16 sps:$4 sm:$0xff]   ;;  %v4340_v26 = vld [vmem:[%s5510_s29 + $0xc4] ss:$16 sps:$4 sm:$0xff]   ;;  %v4342_v27 = vld [vmem:[%s5510_s29 + $0xcc] ss:$16 sps:$4 sm:$0xff]  }
  0xeb   : > { %v4344_v28 = vld [vmem:[%s5510_s29 + $0xc0] ss:$16 sps:$4 sm:$0xff]   ;;  %v4345_v29 = vld [vmem:[%s5510_s29 + $0xc8] ss:$16 sps:$4 sm:$0xff]   ;;  %v4346_v30 = vld [vmem:[%s5510_s29 + $0xe4] ss:$16 sps:$4 sm:$0xff]  }
  0xec   : > { %v4348_v31 = vld [vmem:[%s5510_s29 + $0xec] ss:$16 sps:$4 sm:$0xff]   ;;  %v4350_v32 = vld [vmem:[%s5510_s29 + $0xe0] ss:$16 sps:$4 sm:$0xff]   ;;  %v4351_v33 = vld [vmem:[%s5510_s29 + $0xe8] ss:$16 sps:$4 sm:$0xff]  }
  0xed   : > { %769 = vmatpush1.bf16.msra.mxu0 %v4320_v12  ;;  %810 = vmatpush1.bf16.msra.mxu1 %v4321_v13  ;;  %v571_v34 = vld [vmem:[%s5503_s23] sm:$0xf]  ;;  %v569_v36 = vld [vmem:[#allocation2 + $0x10] sm:$0xff]  ;;  %v568_v37 = vld [vmem:[#allocation2 + $0x8] sm:$0xff]  ;;  %s5716_s16 = sld [smem:[#allocation23_spill]] (!%p3758_p1)  ;;  %s5717_s22 = sld [smem:[#allocation24_spill]] (!%p3758_p1) }
  0xee   : > { %770 = vmatprep.subr.bf16.mxu0 %v4322_v14  ;;  %811 = vmatprep.subr.bf16.mxu1 %v4324_v15  ;;  %v567_v35 = vld [vmem:[#allocation2] sm:$0xff]  ;;  %v570_v38 = vld [vmem:[#allocation2 + $0x18] sm:$0xff]  ;;  %vm5154_vm0 = vmmov (!%p3758_p1), 0   ;;  %s5718_s25 = sld [smem:[#allocation25_spill]] (!%p3758_p1)  ;;  %s5719_s10 = sld [smem:[#allocation26_spill]] (!%p3758_p1) }
  0xef   : > { %v4352_v51 = vld [vmem:[#allocation8 + $0x4] ss:$16 sps:$4 sm:$0xff] (!%p3758_p1)   ;;  %v4354_v52 = vld [vmem:[#allocation8 + $0xc] ss:$16 sps:$4 sm:$0xff] (!%p3758_p1)   ;;  %v4356_v53 = vld [vmem:[#allocation8] ss:$16 sps:$4 sm:$0xff] (!%p3758_p1)  }
  0xf0   : > { %v4357_v54 = vld [vmem:[#allocation8 + $0x8] ss:$16 sps:$4 sm:$0xff] (!%p3758_p1)   ;;  %v4358_v55 = vld [vmem:[#allocation8 + $0x24] ss:$16 sps:$4 sm:$0xff] (!%p3758_p1)   ;;  %v4360_v56 = vld [vmem:[#allocation8 + $0x2c] ss:$16 sps:$4 sm:$0xff] (!%p3758_p1)  }
  0xf1   : > { %771 = vmatpush1.bf16.msra.mxu0 %v4326_v16  ;;  %812 = vmatpush1.bf16.msra.mxu1 %v4327_v17  ;;  %v4362_v57 = vld [vmem:[#allocation8 + $0x20] ss:$16 sps:$4 sm:$0xff] (!%p3758_p1)   ;;  %v4363_v58 = vld [vmem:[#allocation8 + $0x28] ss:$16 sps:$4 sm:$0xff] (!%p3758_p1)   ;;  %v4364_v59 = vld [vmem:[#allocation8 + $0x44] ss:$16 sps:$4 sm:$0xff] (!%p3758_p1)  }
  0xf2   : > { %772 = vmatprep.subr.bf16.mxu0 %v4328_v18  ;;  %813 = vmatprep.subr.bf16.mxu1 %v4330_v19  ;;  %v4366_v60 = vld [vmem:[#allocation8 + $0x4c] ss:$16 sps:$4 sm:$0xff] (!%p3758_p1)   ;;  %v4368_v61 = vld [vmem:[#allocation8 + $0x40] ss:$16 sps:$4 sm:$0xff] (!%p3758_p1)   ;;  %v4369_v62 = vld [vmem:[#allocation8 + $0x48] ss:$16 sps:$4 sm:$0xff] (!%p3758_p1)  }
  0xf3   : > { %v4370_v63 = vld [vmem:[#allocation8 + $0x64] ss:$16 sps:$4 sm:$0xff] (!%p3758_p1)   ;;  %v4372_v0 = vld [vmem:[#allocation8 + $0x6c] ss:$16 sps:$4 sm:$0xff] (!%p3758_p1)   ;;  %v4374_v1 = vld [vmem:[#allocation8 + $0x60] ss:$16 sps:$4 sm:$0xff] (!%p3758_p1)  }
  0xf4   : > { %v4375_v2 = vld [vmem:[#allocation8 + $0x68] ss:$16 sps:$4 sm:$0xff] (!%p3758_p1)   ;;  %v4376_v3 = vld [vmem:[#allocation8 + $0x84] ss:$16 sps:$4 sm:$0xff] (!%p3758_p1)   ;;  %v4378_v4 = vld [vmem:[#allocation8 + $0x8c] ss:$16 sps:$4 sm:$0xff] (!%p3758_p1)  }
  0xf5   : > { %773 = vmatpush1.bf16.msra.mxu0 %v4332_v20  ;;  %814 = vmatpush1.bf16.msra.mxu1 %v4333_v21  ;;  %v4380_v5 = vld [vmem:[#allocation8 + $0x80] ss:$16 sps:$4 sm:$0xff] (!%p3758_p1)   ;;  %v4381_v6 = vld [vmem:[#allocation8 + $0x88] ss:$16 sps:$4 sm:$0xff] (!%p3758_p1)   ;;  %v4382_v7 = vld [vmem:[#allocation8 + $0xa4] ss:$16 sps:$4 sm:$0xff] (!%p3758_p1)  }
  0xf6   : > { %774 = vmatprep.subr.bf16.mxu0 %v4334_v22  ;;  %815 = vmatprep.subr.bf16.mxu1 %v4336_v23  ;;  %v4384_v8 = vld [vmem:[#allocation8 + $0xac] ss:$16 sps:$4 sm:$0xff] (!%p3758_p1)   ;;  %v4386_v9 = vld [vmem:[#allocation8 + $0xa0] ss:$16 sps:$4 sm:$0xff] (!%p3758_p1)   ;;  %v4387_v10 = vld [vmem:[#allocation8 + $0xa8] ss:$16 sps:$4 sm:$0xff] (!%p3758_p1)  }
  0xf7   : > { %v4388_v11 = vld [vmem:[#allocation8 + $0xc4] ss:$16 sps:$4 sm:$0xff] (!%p3758_p1)   ;;  %v4390_v12 = vld [vmem:[#allocation8 + $0xcc] ss:$16 sps:$4 sm:$0xff] (!%p3758_p1)   ;;  %v4392_v13 = vld [vmem:[#allocation8 + $0xc0] ss:$16 sps:$4 sm:$0xff] (!%p3758_p1)  }
  0xf8   : > { %v4393_v14 = vld [vmem:[#allocation8 + $0xc8] ss:$16 sps:$4 sm:$0xff] (!%p3758_p1)   ;;  %v4394_v15 = vld [vmem:[#allocation8 + $0xe4] ss:$16 sps:$4 sm:$0xff] (!%p3758_p1)   ;;  %v4396_v16 = vld [vmem:[#allocation8 + $0xec] ss:$16 sps:$4 sm:$0xff] (!%p3758_p1)  }
  0xf9   : > { %775 = vmatpush1.bf16.msra.mxu0 %v4338_v24  ;;  %816 = vmatpush1.bf16.msra.mxu1 %v4339_v25  ;;  %v4398_v17 = vld [vmem:[#allocation8 + $0xe0] ss:$16 sps:$4 sm:$0xff] (!%p3758_p1)   ;;  %v4399_v18 = vld [vmem:[#allocation8 + $0xe8] ss:$16 sps:$4 sm:$0xff] (!%p3758_p1)   ;;  %v4400_v19 = vld [vmem:[#allocation8 + $0x104] ss:$16 sps:$4 sm:$0xff] (!%p3758_p1)   ;;  %v864_v24 = vlaneseq (!%p3758_p1) }
  0xfa   : > { %776 = vmatprep.subr.bf16.mxu0 %v4340_v26  ;;  %817 = vmatprep.subr.bf16.mxu1 %v4342_v27  ;;  %v4402_v20 = vld [vmem:[#allocation8 + $0x10c] ss:$16 sps:$4 sm:$0xff] (!%p3758_p1)   ;;  %v4404_v21 = vld [vmem:[#allocation8 + $0x100] ss:$16 sps:$4 sm:$0xff] (!%p3758_p1)   ;;  %v4405_v22 = vld [vmem:[#allocation8 + $0x108] ss:$16 sps:$4 sm:$0xff] (!%p3758_p1)  }
  0xfb   : > { %v4406_v23 = vld [vmem:[#allocation8 + $0x124] ss:$16 sps:$4 sm:$0xff] (!%p3758_p1)   ;;  %v4408_v25 = vld [vmem:[#allocation8 + $0x12c] ss:$16 sps:$4 sm:$0xff] (!%p3758_p1)   ;;  %v4410_v26 = vld [vmem:[#allocation8 + $0x120] ss:$16 sps:$4 sm:$0xff] (!%p3758_p1)  }
  0xfc   : > { %v4411_v27 = vld [vmem:[#allocation8 + $0x128] ss:$16 sps:$4 sm:$0xff] (!%p3758_p1)  }
  0xfd   : > { %777 = vmatpush1.bf16.msra.mxu0 %v4344_v28  ;;  %818 = vmatpush1.bf16.msra.mxu1 %v4345_v29  ;;  %v4412_v28 = vld [vmem:[#allocation8 + $0x144] ss:$16 sps:$4 sm:$0xff] (!%p3758_p1)   ;;  %v5564_v29 = vshrl.u32 (!%p3758_p1), %v864_v24, 7 }
  0xfe   : > { %778 = vmatprep.subr.bf16.mxu0 %v4346_v30  ;;  %819 = vmatprep.subr.bf16.mxu1 %v4348_v31  ;;  %v4414_v30 = vld [vmem:[#allocation8 + $0x14c] ss:$16 sps:$4 sm:$0xff] (!%p3758_p1)   ;;  %v4416_v31 = vld [vmem:[#allocation8 + $0x140] ss:$16 sps:$4 sm:$0xff] (!%p3758_p1)  }
 0x101   : > { %779 = vmatpush1.bf16.msra.mxu0 %v4350_v32  ;;  %820 = vmatpush1.bf16.msra.mxu1 %v4351_v33  ;;  %v4417_v32 = vld [vmem:[#allocation8 + $0x148] ss:$16 sps:$4 sm:$0xff] (!%p3758_p1)   ;;  %v4418_v33 = vld [vmem:[#allocation8 + $0x164] ss:$16 sps:$4 sm:$0xff] (!%p3758_p1)  }
 0x102   : > { %1682 = vmatprep.subr.bf16.mxu0 (!%p3758_p1), %v4352_v51  ;;  %1764 = vmatprep.subr.bf16.mxu1 (!%p3758_p1), %v4354_v52  ;;  %v4435_v51 = vld [vmem:[#allocation8 + $0x1a8] ss:$16 sps:$4 sm:$0xff] (!%p3758_p1)   ;;  %v4436_v52 = vld [vmem:[#allocation8 + $0x1c4] ss:$16 sps:$4 sm:$0xff] (!%p3758_p1)  }
 0x104   : > { %797 = vmatmul.mubr.bf16.vlgmr.msra.gmra.mrb[0].mxu0 %v571_v34  ;;  %838 = vmatmul.mubr.bf16.vlgmr.msra.gmra.mrb[0].mxu1 %v571_v34  ;;  %v5567_v34 = vsub.s32 (!%p3758_p1), 1, %v5564_v29 }
 0x105   : > { %1683 = vmatpush1.bf16.msra.mxu0 (!%p3758_p1), %v4356_v53  ;;  %1765 = vmatpush1.bf16.msra.mxu1 (!%p3758_p1), %v4357_v54  ;;  %v4438_v53 = vld [vmem:[#allocation8 + $0x1cc] ss:$16 sps:$4 sm:$0xff] (!%p3758_p1)   ;;  %v4440_v54 = vld [vmem:[#allocation8 + $0x1c0] ss:$16 sps:$4 sm:$0xff] (!%p3758_p1)  }
 0x106   : > { %1684 = vmatprep.subr.bf16.mxu0 (!%p3758_p1), %v4358_v55  ;;  %1766 = vmatprep.subr.bf16.mxu1 (!%p3758_p1), %v4360_v56  ;;  %v4441_v55 = vld [vmem:[#allocation8 + $0x1c8] ss:$16 sps:$4 sm:$0xff] (!%p3758_p1)  }
 0x109   : > { %1685 = vmatpush1.bf16.msra.mxu0 (!%p3758_p1), %v4362_v57  ;;  %1767 = vmatpush1.bf16.msra.mxu1 (!%p3758_p1), %v4363_v58  ;;  %v4442_v57 = vld [vmem:[#allocation8 + $0x1e4] ss:$16 sps:$4 sm:$0xff] (!%p3758_p1)  }
 0x10a   : > { %1686 = vmatprep.subr.bf16.mxu0 (!%p3758_p1), %v4364_v59  ;;  %1768 = vmatprep.subr.bf16.mxu1 (!%p3758_p1), %v4366_v60  ;;  %v4444_v59 = vld [vmem:[#allocation8 + $0x1ec] ss:$16 sps:$4 sm:$0xff] (!%p3758_p1)   ;;  %v4446_v60 = vld [vmem:[#allocation8 + $0x1e0] ss:$16 sps:$4 sm:$0xff] (!%p3758_p1)  }
 0x10d   : > { %1687 = vmatpush1.bf16.msra.mxu0 (!%p3758_p1), %v4368_v61  ;;  %1769 = vmatpush1.bf16.msra.mxu1 (!%p3758_p1), %v4369_v62  ;;  %v4447_v62 = vld [vmem:[#allocation8 + $0x1e8] ss:$16 sps:$4 sm:$0xff] (!%p3758_p1)  }
 0x10e   : > { %1688 = vmatprep.subr.bf16.mxu0 (!%p3758_p1), %v4370_v63  ;;  %1770 = vmatprep.subr.bf16.mxu1 (!%p3758_p1), %v4372_v0  ;;  %v4450_v63 = vld [vmem:[#allocation8 + $0x204] ss:$16 sps:$4 sm:$0xff] (!%p3758_p1)   ;;  %v4453_v0 = vld [vmem:[#allocation8 + $0x20c] ss:$16 sps:$4 sm:$0xff] (!%p3758_p1)  }
 0x111   : > { %1689 = vmatpush1.bf16.msra.mxu0 (!%p3758_p1), %v4374_v1  ;;  %1771 = vmatpush1.bf16.msra.mxu1 (!%p3758_p1), %v4375_v2  ;;  %v4448_v1 = vld [vmem:[#allocation8 + $0x200] ss:$16 sps:$4 sm:$0xff] (!%p3758_p1)  }
 0x112   : > { %1690 = vmatprep.subr.bf16.mxu0 (!%p3758_p1), %v4376_v3  ;;  %1772 = vmatprep.subr.bf16.mxu1 (!%p3758_p1), %v4378_v4  ;;  %v4451_v3 = vld [vmem:[#allocation8 + $0x208] ss:$16 sps:$4 sm:$0xff] (!%p3758_p1)   ;;  %v4456_v4 = vld [vmem:[#allocation8 + $0x224] ss:$16 sps:$4 sm:$0xff] (!%p3758_p1)  }
 0x115   : > { %1691 = vmatpush1.bf16.msra.mxu0 (!%p3758_p1), %v4380_v5  ;;  %1773 = vmatpush1.bf16.msra.mxu1 (!%p3758_p1), %v4381_v6  ;;  %v4459_v5 = vld [vmem:[#allocation8 + $0x22c] ss:$16 sps:$4 sm:$0xff] (!%p3758_p1)   ;;  %v4454_v6 = vld [vmem:[#allocation8 + $0x220] ss:$16 sps:$4 sm:$0xff] (!%p3758_p1)  }
 0x116   : > { %1692 = vmatprep.subr.bf16.mxu0 (!%p3758_p1), %v4382_v7  ;;  %1774 = vmatprep.subr.bf16.mxu1 (!%p3758_p1), %v4384_v8  ;;  %v4457_v7 = vld [vmem:[#allocation8 + $0x228] ss:$16 sps:$4 sm:$0xff] (!%p3758_p1)   ;;  %v4462_v8 = vld [vmem:[#allocation8 + $0x244] ss:$16 sps:$4 sm:$0xff] (!%p3758_p1)  }
 0x119   : > { %1693 = vmatpush1.bf16.msra.mxu0 (!%p3758_p1), %v4386_v9  ;;  %1775 = vmatpush1.bf16.msra.mxu1 (!%p3758_p1), %v4387_v10  ;;  %v4465_v9 = vld [vmem:[#allocation8 + $0x24c] ss:$16 sps:$4 sm:$0xff] (!%p3758_p1)   ;;  %v4460_v10 = vld [vmem:[#allocation8 + $0x240] ss:$16 sps:$4 sm:$0xff] (!%p3758_p1)  }
 0x11a   : > { %1694 = vmatprep.subr.bf16.mxu0 (!%p3758_p1), %v4388_v11  ;;  %1776 = vmatprep.subr.bf16.mxu1 (!%p3758_p1), %v4390_v12  ;;  %v4463_v11 = vld [vmem:[#allocation8 + $0x248] ss:$16 sps:$4 sm:$0xff] (!%p3758_p1)   ;;  %v4468_v12 = vld [vmem:[#allocation8 + $0x264] ss:$16 sps:$4 sm:$0xff] (!%p3758_p1)  }
 0x11d   : > { %1695 = vmatpush1.bf16.msra.mxu0 (!%p3758_p1), %v4392_v13  ;;  %1777 = vmatpush1.bf16.msra.mxu1 (!%p3758_p1), %v4393_v14  ;;  %v4471_v13 = vld [vmem:[#allocation8 + $0x26c] ss:$16 sps:$4 sm:$0xff] (!%p3758_p1)   ;;  %v4466_v14 = vld [vmem:[#allocation8 + $0x260] ss:$16 sps:$4 sm:$0xff] (!%p3758_p1)  }
 0x11e   : > { %1696 = vmatprep.subr.bf16.mxu0 (!%p3758_p1), %v4394_v15  ;;  %1778 = vmatprep.subr.bf16.mxu1 (!%p3758_p1), %v4396_v16  ;;  %v4469_v15 = vld [vmem:[#allocation8 + $0x268] ss:$16 sps:$4 sm:$0xff] (!%p3758_p1)   ;;  %v4474_v16 = vld [vmem:[#allocation8 + $0x284] ss:$16 sps:$4 sm:$0xff] (!%p3758_p1)  }
 0x121   : > { %1697 = vmatpush1.bf16.msra.mxu0 (!%p3758_p1), %v4398_v17  ;;  %1779 = vmatpush1.bf16.msra.mxu1 (!%p3758_p1), %v4399_v18  ;;  %v4477_v17 = vld [vmem:[#allocation8 + $0x28c] ss:$16 sps:$4 sm:$0xff] (!%p3758_p1)   ;;  %v4472_v18 = vld [vmem:[#allocation8 + $0x280] ss:$16 sps:$4 sm:$0xff] (!%p3758_p1)  }
 0x122   : > { %1698 = vmatprep.subr.bf16.mxu0 (!%p3758_p1), %v4400_v19  ;;  %1780 = vmatprep.subr.bf16.mxu1 (!%p3758_p1), %v4402_v20  ;;  %v5582_v19 = vsub.s32 (!%p3758_p1), 3, %v5564_v29  ;;  %v4475_v20 = vld [vmem:[#allocation8 + $0x288] ss:$16 sps:$4 sm:$0xff] (!%p3758_p1)  }
 0x125   : > { %1699 = vmatpush1.bf16.msra.mxu0 (!%p3758_p1), %v4404_v21  ;;  %1781 = vmatpush1.bf16.msra.mxu1 (!%p3758_p1), %v4405_v22  ;;  %v4480_v21 = vld [vmem:[#allocation8 + $0x2a4] ss:$16 sps:$4 sm:$0xff] (!%p3758_p1)   ;;  %v4483_v22 = vld [vmem:[#allocation8 + $0x2ac] ss:$16 sps:$4 sm:$0xff] (!%p3758_p1)  }
 0x126   : > { %1700 = vmatprep.subr.bf16.mxu0 (!%p3758_p1), %v4406_v23  ;;  %1782 = vmatprep.subr.bf16.mxu1 (!%p3758_p1), %v4408_v25  ;;  %v4478_v23 = vld [vmem:[#allocation8 + $0x2a0] ss:$16 sps:$4 sm:$0xff] (!%p3758_p1)   ;;  %v4481_v25 = vld [vmem:[#allocation8 + $0x2a8] ss:$16 sps:$4 sm:$0xff] (!%p3758_p1)  }
 0x129   : > { %1701 = vmatpush1.bf16.msra.mxu0 (!%p3758_p1), %v4410_v26  ;;  %1783 = vmatpush1.bf16.msra.mxu1 (!%p3758_p1), %v4411_v27  ;;  %v4486_v26 = vld [vmem:[#allocation8 + $0x2c4] ss:$16 sps:$4 sm:$0xff] (!%p3758_p1)   ;;  %v4489_v27 = vld [vmem:[#allocation8 + $0x2cc] ss:$16 sps:$4 sm:$0xff] (!%p3758_p1)  }
 0x12a   : > { %1702 = vmatprep.subr.bf16.mxu0 (!%p3758_p1), %v4412_v28  ;;  %1784 = vmatprep.subr.bf16.mxu1 (!%p3758_p1), %v4414_v30  ;;  %v4484_v30 = vld [vmem:[#allocation8 + $0x2c0] ss:$16 sps:$4 sm:$0xff] (!%p3758_p1)  }
 0x12d   : > { %1703 = vmatpush1.bf16.msra.mxu0 (!%p3758_p1), %v4416_v31  ;;  %1785 = vmatpush1.bf16.msra.mxu1 (!%p3758_p1), %v4417_v32  ;;  %v4487_v32 = vld [vmem:[#allocation8 + $0x2c8] ss:$16 sps:$4 sm:$0xff] (!%p3758_p1)  }
 0x12e   : > { %1704 = vmatprep.subr.bf16.mxu0 (!%p3758_p1), %v4418_v33  ;;  %v4492_v33 = vld [vmem:[#allocation8 + $0x2e4] ss:$16 sps:$4 sm:$0xff] (!%p3758_p1)  }
 0x1d5   : > { %857 = sbr.rel (%p3758_p1) target bundleno = 1773 (0x6ed), region = 108 }
 0x1d7   : > { %v798_v39 = vpop.f32.mrb[0].mxu0  ;;  %v839_v40 = vpop.f32.mrb[0].mxu1 }
 0x1d8   : > { %v846_v41 = vadd.f32 %v798_v39, %v567_v35  ;;  %v848_v42 = vadd.f32 %v839_v40, %v569_v36  ;;  %v800_v43 = vpop.f32.mrb[1].mxu0  ;;  %v841_v44 = vpop.f32.mrb[1].mxu1  ;;  %v4420_v35 = vld [vmem:[#allocation8 + $0x16c] ss:$16 sps:$4 sm:$0xff] (!%p3758_p1)   ;;  %v4423_v39 = vld [vmem:[#allocation8 + $0x168] ss:$16 sps:$4 sm:$0xff] (!%p3758_p1)  }
 0x1d9   : > { %v847_v45 = vadd.f32 %v800_v43, %v568_v37  ;;  %v849_v46 = vadd.f32 %v841_v44, %v570_v38  ;;  %v802_v47 = vpop.f32.mrb[2].mxu0  ;;  %v843_v48 = vpop.f32.mrb[2].mxu1  ;;  %v5572_v37 = vld [vmem:[%s5672_s2] sm:$0xf] (!%p3758_p1)  ;;  %v4422_v38 = vld [vmem:[#allocation8 + $0x160] ss:$16 sps:$4 sm:$0xff] (!%p3758_p1)   ;;  %1786 = vmatprep.subr.bf16.mxu1 (!%p3758_p1), %v4420_v35 }
 0x1da   : > { %850 = vst [vmem:[#allocation2] sm:$0xff] %v846_v41  ;;  %852 = vst [vmem:[#allocation2 + $0x10] sm:$0xff] %v848_v42  ;;  %v803_v49 = vpop.f32.mrb[3].mxu0  ;;  %v844_v50 = vpop.f32.mrb[3].mxu1  ;;  %v871_v40 = vrot.slane (!%p3758_p1), %v5572_v37, %v5567_v34  ;;  %v4424_v41 = vld [vmem:[#allocation8 + $0x184] ss:$16 sps:$4 sm:$0xff] (!%p3758_p1)   ;;  %1705 = vmatpush1.bf16.msra.mxu0 (!%p3758_p1), %v4422_v38  ;;  %1787 = vmatpush1.bf16.msra.mxu1 (!%p3758_p1), %v4423_v39  ;;  %v879_v24 = vrot.slane (!%p3758_p1), %v5572_v37, %v5582_v19 }
 0x1db   : > { %851 = vst [vmem:[#allocation2 + $0x8] sm:$0xff] %v847_v45  ;;  %853 = vst [vmem:[#allocation2 + $0x18] sm:$0xff] %v849_v46  ;;  %v4426_v42 = vld [vmem:[#allocation8 + $0x18c] ss:$16 sps:$4 sm:$0xff] (!%p3758_p1)   ;;  %v4428_v44 = vld [vmem:[#allocation8 + $0x180] ss:$16 sps:$4 sm:$0xff] (!%p3758_p1)   ;;  %1706 = vmatprep.subr.bf16.mxu0 (!%p3758_p1), %v4424_v41 }
 0x1dc   : > { %v4429_v45 = vld [vmem:[#allocation8 + $0x188] ss:$16 sps:$4 sm:$0xff]   ;;  %v4430_v46 = vld [vmem:[#allocation8 + $0x1a4] ss:$16 sps:$4 sm:$0xff]   ;;  %1788 = vmatprep.subr.bf16.mxu1 %v4426_v42  ;;  %v4432_v48 = vld [vmem:[#allocation8 + $0x1ac] ss:$16 sps:$4 sm:$0xff]  }
 0x1dd   : > { %v4434_v49 = vld [vmem:[#allocation8 + $0x1a0] ss:$16 sps:$4 sm:$0xff]   ;;  %v5577_v50 = vsub.s32 0, %v5564_v29  ;;  %v4495_v35 = vld [vmem:[#allocation8 + $0x2ec] ss:$16 sps:$4 sm:$0xff]  }
 0x1de   : > { %1707 = vmatpush1.bf16.msra.mxu0 %v4428_v44  ;;  %1789 = vmatpush1.bf16.msra.mxu1 %v4429_v45  ;;  %v4490_v38 = vld [vmem:[#allocation8 + $0x2e0] ss:$16 sps:$4 sm:$0xff]   ;;  %v4493_v39 = vld [vmem:[#allocation8 + $0x2e8] ss:$16 sps:$4 sm:$0xff]   ;;  %v4501_v41 = vld [vmem:[#allocation8 + $0x30c] ss:$16 sps:$4 sm:$0xff]  }
 0x1df   : > { %1708 = vmatprep.subr.bf16.mxu0 %v4430_v46  ;;  %1790 = vmatprep.subr.bf16.mxu1 %v4432_v48  ;;  %v867_v56 = vrot.slane %v5572_v37, %v5577_v50  ;;  %v4496_v42 = vld [vmem:[#allocation8 + $0x300] ss:$16 sps:$4 sm:$0xff]   ;;  %v4504_v44 = vld [vmem:[#allocation8 + $0x324] ss:$16 sps:$4 sm:$0xff]   ;;  %v4507_v45 = vld [vmem:[#allocation8 + $0x32c] ss:$16 sps:$4 sm:$0xff]  }
 0x1e0   : > { %v4502_v46 = vld [vmem:[#allocation8 + $0x320] ss:$16 sps:$4 sm:$0xff]   ;;  %v4510_v48 = vld [vmem:[#allocation8 + $0x344] ss:$16 sps:$4 sm:$0xff]  }
 0x1e1   : > { %v858_v58 = vld [vmem:[#allocation2] sm:$0xff] }
 0x1e2   : > { %v859_v36 = vld [vmem:[#allocation2 + $0x8] sm:$0xff]  ;;  %1709 = vmatpush1.bf16.msra.mxu0 %v4434_v49  ;;  %1791 = vmatpush1.bf16.msra.mxu1 %v4435_v51  ;;  %v884_v61 = vadd.f32 %v867_v56, %v858_v58  ;;  %v861_v28 = vld [vmem:[#allocation2 + $0x18] sm:$0xff]  ;;  %v4513_v49 = vld [vmem:[#allocation8 + $0x34c] ss:$16 sps:$4 sm:$0xff]  }
 0x1e3   : > { %v885_v43 = vadd.f32 %v871_v40, %v859_v36  ;;  %1710 = vmatprep.subr.bf16.mxu0 %v4436_v52  ;;  %1792 = vmatprep.subr.bf16.mxu1 %v4438_v53  ;;  %v887_v31 = vadd.f32 %v879_v24, %v861_v28  ;;  %v4498_v40 = vld [vmem:[#allocation8 + $0x304] ss:$16 sps:$4 sm:$0xff]   ;;  %v4508_v51 = vld [vmem:[#allocation8 + $0x340] ss:$16 sps:$4 sm:$0xff]   ;;  %v4511_v52 = vld [vmem:[#allocation8 + $0x348] ss:$16 sps:$4 sm:$0xff]  }
 0x1e4   : > { %v1017_v2 = vpack.c.bf16 %v884_v61, %v884_v61  ;;  %v4516_v53 = vld [vmem:[#allocation8 + $0x364] ss:$16 sps:$4 sm:$0xff]   ;;  %v4517_v56 = vld [vmem:[#allocation8 + $0x368] ss:$16 sps:$4 sm:$0xff]   ;;  %v4525_v58 = vld [vmem:[#allocation8 + $0x38c] ss:$16 sps:$4 sm:$0xff]  }
 0x1e5   : > { %v1018_v47 = vpack.c.bf16 %v885_v43, %v885_v43  ;;  %v1020_v36 = vpack.c.bf16 %v887_v31, %v887_v31  ;;  %v4499_v43 = vld [vmem:[#allocation8 + $0x308] ss:$16 sps:$4 sm:$0xff]   ;;  %v4528_v61 = vld [vmem:[#allocation8 + $0x3a4] ss:$16 sps:$4 sm:$0xff]   ;;  %v4573_v31 = vld [vmem:[#allocation9 + $0x8c] ss:$16 sps:$4 sm:$0xff]  }
 0x1e6   : > { %1711 = vmatpush1.bf16.msra.mxu0 %v4440_v54  ;;  %1793 = vmatpush1.bf16.msra.mxu1 %v4441_v55  ;;  %v4519_v54 = vld [vmem:[#allocation8 + $0x36c] ss:$16 sps:$4 sm:$0xff]   ;;  %v4514_v55 = vld [vmem:[#allocation8 + $0x360] ss:$16 sps:$4 sm:$0xff]   ;;  %v4559_v24 = vld [vmem:[#allocation9 + $0x48] ss:$16 sps:$4 sm:$0xff]  }
 0x1e7   : > { %1714 = vmatprep.mubr.bf16.mxu0 %v1018_v47  ;;  %1796 = vmatprep.mubr.bf16.mxu1 %v1018_v47  ;;  %v4505_v47 = vld [vmem:[#allocation8 + $0x328] ss:$16 sps:$4 sm:$0xff]  }
 0x1e8   : > { %1712 = vmatprep.subr.bf16.mxu0 %v4442_v57  ;;  %1794 = vmatprep.subr.bf16.mxu1 %v4444_v59  ;;  %v4522_v57 = vld [vmem:[#allocation8 + $0x384] ss:$16 sps:$4 sm:$0xff]   ;;  %v4520_v59 = vld [vmem:[#allocation8 + $0x380] ss:$16 sps:$4 sm:$0xff]   ;;  %v4565_v28 = vld [vmem:[#allocation9 + $0x68] ss:$16 sps:$4 sm:$0xff]  }
 0x1ea   : > { %1713 = vmatpush1.bf16.msra.mxu0 %v4446_v60  ;;  %1795 = vmatpush1.bf16.msra.mxu1 %v4447_v62  ;;  %v4523_v60 = vld [vmem:[#allocation8 + $0x388] ss:$16 sps:$4 sm:$0xff]   ;;  %v4531_v62 = vld [vmem:[#allocation8 + $0x3ac] ss:$16 sps:$4 sm:$0xff]  }
 0x1eb   : > { %1723 = vmatprep.subr.bf16.mxu0 %v4450_v63  ;;  %1805 = vmatprep.subr.bf16.mxu1 %v4453_v0  ;;  %v4526_v63 = vld [vmem:[#allocation8 + $0x3a0] ss:$16 sps:$4 sm:$0xff]   ;;  %v5587_v0 = vsub.s32 2, %v5564_v29  ;;  %v4543_v29 = vld [vmem:[#allocation8 + $0x3ec] ss:$16 sps:$4 sm:$0xff]  }
 0x1ed   : > { %1715 = vmatmul.mubr.bf16.vlgmr.msra.gmra.mrb[0].mxu0 %v1017_v2  ;;  %1797 = vmatmul.mubr.bf16.vlgmr.msra.gmra.mrb[0].mxu1 %v1017_v2  ;;  %v4534_v2 = vld [vmem:[#allocation8 + $0x3c4] ss:$16 sps:$4 sm:$0xff]  }
 0x1ee   : > { %1724 = vmatpush1.bf16.msra.mxu0 %v4448_v1  ;;  %1806 = vmatpush1.bf16.msra.mxu1 %v4451_v3  ;;  %v4529_v1 = vld [vmem:[#allocation8 + $0x3a8] ss:$16 sps:$4 sm:$0xff]   ;;  %v4537_v3 = vld [vmem:[#allocation8 + $0x3cc] ss:$16 sps:$4 sm:$0xff]  }
 0x1ef   : > { %1725 = vmatprep.subr.bf16.mxu0 %v4456_v4  ;;  %1807 = vmatprep.subr.bf16.mxu1 %v4459_v5  ;;  %v4532_v4 = vld [vmem:[#allocation8 + $0x3c0] ss:$16 sps:$4 sm:$0xff]   ;;  %v4535_v5 = vld [vmem:[#allocation8 + $0x3c8] ss:$16 sps:$4 sm:$0xff]  }
 0x1f0   : > { %1755 = vmatprep.mubr.bf16.mxu0 %v1020_v36  ;;  %1837 = vmatprep.mubr.bf16.mxu1 %v1020_v36  ;;  %v4579_v36 = vld [vmem:[#allocation9 + $0xac] ss:$16 sps:$4 sm:$0xff]  }
 0x1f2   : > { %1726 = vmatpush1.bf16.msra.mxu0 %v4454_v6  ;;  %1808 = vmatpush1.bf16.msra.mxu1 %v4457_v7  ;;  %v875_v6 = vrot.slane %v5572_v37, %v5587_v0  ;;  %v860_v7 = vld [vmem:[#allocation2 + $0x10] sm:$0xff]  ;;  %v4552_v37 = vld [vmem:[#allocation9 + $0x24] ss:$16 sps:$4 sm:$0xff]  }
 0x1f3   : > { %1727 = vmatprep.subr.bf16.mxu0 %v4462_v8  ;;  %1809 = vmatprep.subr.bf16.mxu1 %v4465_v9  ;;  %v4540_v8 = vld [vmem:[#allocation8 + $0x3e4] ss:$16 sps:$4 sm:$0xff]   ;;  %v4538_v9 = vld [vmem:[#allocation8 + $0x3e0] ss:$16 sps:$4 sm:$0xff]  }
 0x1f6   : > { %1728 = vmatpush1.bf16.msra.mxu0 %v4460_v10  ;;  %1810 = vmatpush1.bf16.msra.mxu1 %v4463_v11  ;;  %v886_v10 = vadd.f32 %v875_v6, %v860_v7  ;;  %v4541_v11 = vld [vmem:[#allocation8 + $0x3e8] ss:$16 sps:$4 sm:$0xff]   ;;  %v4624_v6 = vld [vmem:[#allocation9 + $0x1a4] ss:$16 sps:$4 sm:$0xff]   ;;  %v4627_v7 = vld [vmem:[#allocation9 + $0x1ac] ss:$16 sps:$4 sm:$0xff]  }
 0x1f7   : > { %1729 = vmatprep.subr.bf16.mxu0 %v4468_v12  ;;  %1811 = vmatprep.subr.bf16.mxu1 %v4471_v13  ;;  %v4546_v12 = vld [vmem:[#allocation9 + $0x4] ss:$16 sps:$4 sm:$0xff]   ;;  %v4549_v13 = vld [vmem:[#allocation9 + $0xc] ss:$16 sps:$4 sm:$0xff]  }
 0x1fa   : > { %1730 = vmatpush1.bf16.msra.mxu0 %v4466_v14  ;;  %1812 = vmatpush1.bf16.msra.mxu1 %v4469_v15  ;;  %v4544_v14 = vld [vmem:[#allocation9] ss:$16 sps:$4 sm:$0xff]   ;;  %v4547_v15 = vld [vmem:[#allocation9 + $0x8] ss:$16 sps:$4 sm:$0xff]  }
 0x1fb   : > { %1731 = vmatprep.subr.bf16.mxu0 %v4474_v16  ;;  %1813 = vmatprep.subr.bf16.mxu1 %v4477_v17  ;;  %v1019_v16 = vpack.c.bf16 %v886_v10, %v886_v10  ;;  %v4555_v17 = vld [vmem:[#allocation9 + $0x2c] ss:$16 sps:$4 sm:$0xff]  }
 0x1fc   : > { %v4633_v10 = vld [vmem:[#allocation9 + $0x1cc] ss:$16 sps:$4 sm:$0xff]  }
 0x1fe   : > { %1732 = vmatpush1.bf16.msra.mxu0 %v4472_v18  ;;  %1814 = vmatpush1.bf16.msra.mxu1 %v4475_v20  ;;  %v4550_v18 = vld [vmem:[#allocation9 + $0x20] ss:$16 sps:$4 sm:$0xff]   ;;  %v4553_v20 = vld [vmem:[#allocation9 + $0x28] ss:$16 sps:$4 sm:$0xff]  }
 0x1ff   : > { %1733 = vmatprep.subr.bf16.mxu0 %v4480_v21  ;;  %1815 = vmatprep.subr.bf16.mxu1 %v4483_v22  ;;  %v4558_v21 = vld [vmem:[#allocation9 + $0x44] ss:$16 sps:$4 sm:$0xff]   ;;  %v4561_v22 = vld [vmem:[#allocation9 + $0x4c] ss:$16 sps:$4 sm:$0xff]  }
 0x202   : > { %1734 = vmatpush1.bf16.msra.mxu0 %v4478_v23  ;;  %1816 = vmatpush1.bf16.msra.mxu1 %v4481_v25  ;;  %v4556_v23 = vld [vmem:[#allocation9 + $0x40] ss:$16 sps:$4 sm:$0xff]   ;;  %v4564_v25 = vld [vmem:[#allocation9 + $0x64] ss:$16 sps:$4 sm:$0xff]  }
 0x203   : > { %1735 = vmatprep.subr.bf16.mxu0 %v4486_v26  ;;  %1817 = vmatprep.subr.bf16.mxu1 %v4489_v27  ;;  %v4567_v26 = vld [vmem:[#allocation9 + $0x6c] ss:$16 sps:$4 sm:$0xff]   ;;  %v4562_v27 = vld [vmem:[#allocation9 + $0x60] ss:$16 sps:$4 sm:$0xff]  }
 0x206   : > { %1736 = vmatpush1.bf16.msra.mxu0 %v4484_v30  ;;  %1818 = vmatpush1.bf16.msra.mxu1 %v4487_v32  ;;  %v4570_v30 = vld [vmem:[#allocation9 + $0x84] ss:$16 sps:$4 sm:$0xff]   ;;  %v4568_v32 = vld [vmem:[#allocation9 + $0x80] ss:$16 sps:$4 sm:$0xff]  }
 0x207   : > { %1737 = vmatprep.subr.bf16.mxu0 %v4492_v33  ;;  %1819 = vmatprep.subr.bf16.mxu1 %v4495_v35  ;;  %v4571_v33 = vld [vmem:[#allocation9 + $0x88] ss:$16 sps:$4 sm:$0xff]   ;;  %v4576_v35 = vld [vmem:[#allocation9 + $0xa4] ss:$16 sps:$4 sm:$0xff]  }
 0x20a   : > { %1738 = vmatpush1.bf16.msra.mxu0 %v4490_v38  ;;  %1820 = vmatpush1.bf16.msra.mxu1 %v4493_v39  ;;  %v4574_v38 = vld [vmem:[#allocation9 + $0xa0] ss:$16 sps:$4 sm:$0xff]   ;;  %v4577_v39 = vld [vmem:[#allocation9 + $0xa8] ss:$16 sps:$4 sm:$0xff]  }
 0x20b   : > { %1739 = vmatprep.subr.bf16.mxu0 %v4498_v40  ;;  %1821 = vmatprep.subr.bf16.mxu1 %v4501_v41  ;;  %v4582_v40 = vld [vmem:[#allocation9 + $0xc4] ss:$16 sps:$4 sm:$0xff]   ;;  %v4585_v41 = vld [vmem:[#allocation9 + $0xcc] ss:$16 sps:$4 sm:$0xff]  }
 0x20e   : > { %1740 = vmatpush1.bf16.msra.mxu0 %v4496_v42  ;;  %1822 = vmatpush1.bf16.msra.mxu1 %v4499_v43  ;;  %v4580_v42 = vld [vmem:[#allocation9 + $0xc0] ss:$16 sps:$4 sm:$0xff]   ;;  %v4583_v43 = vld [vmem:[#allocation9 + $0xc8] ss:$16 sps:$4 sm:$0xff]  }
 0x20f   : > { %1741 = vmatprep.subr.bf16.mxu0 %v4504_v44  ;;  %1823 = vmatprep.subr.bf16.mxu1 %v4507_v45  ;;  %v4588_v44 = vld [vmem:[#allocation9 + $0xe4] ss:$16 sps:$4 sm:$0xff]   ;;  %v4591_v45 = vld [vmem:[#allocation9 + $0xec] ss:$16 sps:$4 sm:$0xff]  }
 0x212   : > { %1742 = vmatpush1.bf16.msra.mxu0 %v4502_v46  ;;  %1824 = vmatpush1.bf16.msra.mxu1 %v4505_v47  ;;  %v4586_v46 = vld [vmem:[#allocation9 + $0xe0] ss:$16 sps:$4 sm:$0xff]   ;;  %v4589_v47 = vld [vmem:[#allocation9 + $0xe8] ss:$16 sps:$4 sm:$0xff]  }
 0x213   : > { %1743 = vmatprep.subr.bf16.mxu0 %v4510_v48  ;;  %1825 = vmatprep.subr.bf16.mxu1 %v4513_v49  ;;  %v4594_v48 = vld [vmem:[#allocation9 + $0x104] ss:$16 sps:$4 sm:$0xff]   ;;  %v4597_v49 = vld [vmem:[#allocation9 + $0x10c] ss:$16 sps:$4 sm:$0xff]  }
 0x216   : > { %1744 = vmatpush1.bf16.msra.mxu0 %v4508_v51  ;;  %1826 = vmatpush1.bf16.msra.mxu1 %v4511_v52  ;;  %v4592_v51 = vld [vmem:[#allocation9 + $0x100] ss:$16 sps:$4 sm:$0xff]   ;;  %v4595_v52 = vld [vmem:[#allocation9 + $0x108] ss:$16 sps:$4 sm:$0xff]  }
 0x217   : > { %1745 = vmatprep.subr.bf16.mxu0 %v4516_v53  ;;  %1827 = vmatprep.subr.bf16.mxu1 %v4519_v54  ;;  %v4600_v53 = vld [vmem:[#allocation9 + $0x124] ss:$16 sps:$4 sm:$0xff]   ;;  %v4603_v54 = vld [vmem:[#allocation9 + $0x12c] ss:$16 sps:$4 sm:$0xff]  }
 0x21a   : > { %1746 = vmatpush1.bf16.msra.mxu0 %v4514_v55  ;;  %1828 = vmatpush1.bf16.msra.mxu1 %v4517_v56  ;;  %v4598_v55 = vld [vmem:[#allocation9 + $0x120] ss:$16 sps:$4 sm:$0xff]   ;;  %v4601_v56 = vld [vmem:[#allocation9 + $0x128] ss:$16 sps:$4 sm:$0xff]  }
 0x21b   : > { %1747 = vmatprep.subr.bf16.mxu0 %v4522_v57  ;;  %1829 = vmatprep.subr.bf16.mxu1 %v4525_v58  ;;  %v4606_v57 = vld [vmem:[#allocation9 + $0x144] ss:$16 sps:$4 sm:$0xff]   ;;  %v4609_v58 = vld [vmem:[#allocation9 + $0x14c] ss:$16 sps:$4 sm:$0xff]  }
 0x21e   : > { %1748 = vmatpush1.bf16.msra.mxu0 %v4520_v59  ;;  %1830 = vmatpush1.bf16.msra.mxu1 %v4523_v60  ;;  %v4604_v59 = vld [vmem:[#allocation9 + $0x140] ss:$16 sps:$4 sm:$0xff]   ;;  %v4607_v60 = vld [vmem:[#allocation9 + $0x148] ss:$16 sps:$4 sm:$0xff]  }
 0x21f   : > { %1749 = vmatprep.subr.bf16.mxu0 %v4528_v61  ;;  %1831 = vmatprep.subr.bf16.mxu1 %v4531_v62  ;;  %v4612_v61 = vld [vmem:[#allocation9 + $0x164] ss:$16 sps:$4 sm:$0xff]   ;;  %v4615_v62 = vld [vmem:[#allocation9 + $0x16c] ss:$16 sps:$4 sm:$0xff]  }
 0x222   : > { %1750 = vmatpush1.bf16.msra.mxu0 %v4526_v63  ;;  %1832 = vmatpush1.bf16.msra.mxu1 %v4529_v1  ;;  %v4610_v63 = vld [vmem:[#allocation9 + $0x160] ss:$16 sps:$4 sm:$0xff]   ;;  %v4613_v1 = vld [vmem:[#allocation9 + $0x168] ss:$16 sps:$4 sm:$0xff]  }
 0x223   : > { %1751 = vmatprep.subr.bf16.mxu0 %v4534_v2  ;;  %1833 = vmatprep.subr.bf16.mxu1 %v4537_v3  ;;  %v4618_v2 = vld [vmem:[#allocation9 + $0x184] ss:$16 sps:$4 sm:$0xff]   ;;  %v4621_v3 = vld [vmem:[#allocation9 + $0x18c] ss:$16 sps:$4 sm:$0xff]  }
 0x226   : > { %1752 = vmatpush1.bf16.msra.mxu0 %v4532_v4  ;;  %1834 = vmatpush1.bf16.msra.mxu1 %v4535_v5  ;;  %v4616_v4 = vld [vmem:[#allocation9 + $0x180] ss:$16 sps:$4 sm:$0xff]   ;;  %v4619_v5 = vld [vmem:[#allocation9 + $0x188] ss:$16 sps:$4 sm:$0xff]  }
 0x227   : > { %1753 = vmatprep.subr.bf16.mxu0 %v4540_v8  ;;  %1835 = vmatprep.subr.bf16.mxu1 %v4543_v29  ;;  %v4622_v8 = vld [vmem:[#allocation9 + $0x1a0] ss:$16 sps:$4 sm:$0xff]   ;;  %v4625_v29 = vld [vmem:[#allocation9 + $0x1a8] ss:$16 sps:$4 sm:$0xff]  }
 0x22a   : > { %1754 = vmatpush1.bf16.msra.mxu0 %v4538_v9  ;;  %1836 = vmatpush1.bf16.msra.mxu1 %v4541_v11  ;;  %v4630_v9 = vld [vmem:[#allocation9 + $0x1c4] ss:$16 sps:$4 sm:$0xff]   ;;  %v4628_v11 = vld [vmem:[#allocation9 + $0x1c0] ss:$16 sps:$4 sm:$0xff]  }
 0x22b   : > { %2640 = vmatprep.subr.bf16.mxu0 %v4546_v12  ;;  %2722 = vmatprep.subr.bf16.mxu1 %v4549_v13  ;;  %v4631_v12 = vld [vmem:[#allocation9 + $0x1c8] ss:$16 sps:$4 sm:$0xff]   ;;  %v4636_v13 = vld [vmem:[#allocation9 + $0x1e4] ss:$16 sps:$4 sm:$0xff]  }
 0x22d   : > { %1756 = vmatmul.mubr.bf16.vlgmr.msra.gmra.mrb[0].mxu0 %v1019_v16  ;;  %1838 = vmatmul.mubr.bf16.vlgmr.msra.gmra.mrb[0].mxu1 %v1019_v16  ;;  %v4637_v16 = vld [vmem:[#allocation9 + $0x1e8] ss:$16 sps:$4 sm:$0xff]  }
 0x22e   : > { %2641 = vmatpush1.bf16.msra.mxu0 %v4544_v14  ;;  %2723 = vmatpush1.bf16.msra.mxu1 %v4547_v15  ;;  %v4639_v14 = vld [vmem:[#allocation9 + $0x1ec] ss:$16 sps:$4 sm:$0xff]   ;;  %v4634_v15 = vld [vmem:[#allocation9 + $0x1e0] ss:$16 sps:$4 sm:$0xff]  }
 0x22f   : > { %2642 = vmatprep.subr.bf16.mxu0 %v4552_v37  ;;  %2724 = vmatprep.subr.bf16.mxu1 %v4555_v17  ;;  %v4642_v37 = vld [vmem:[#allocation9 + $0x204] ss:$16 sps:$4 sm:$0xff]   ;;  %v4645_v17 = vld [vmem:[#allocation9 + $0x20c] ss:$16 sps:$4 sm:$0xff]  }
 0x232   : > { %2643 = vmatpush1.bf16.msra.mxu0 %v4550_v18  ;;  %2725 = vmatpush1.bf16.msra.mxu1 %v4553_v20  ;;  %v5594_v18 = vld [vmem:[%s5674_s4] sm:$0xf] }
 0x233   : > { %2644 = vmatprep.subr.bf16.mxu0 %v4558_v21  ;;  %2726 = vmatprep.subr.bf16.mxu1 %v4561_v22  ;;  %v1025_v20 = vrot.slane %v5594_v18, %v5577_v50  ;;  %v1029_v21 = vrot.slane %v5594_v18, %v5567_v34  ;;  %v1037_v22 = vrot.slane %v5594_v18, %v5582_v19 }
 0x236   : > { %2645 = vmatpush1.bf16.msra.mxu0 %v4556_v23  ;;  %2727 = vmatpush1.bf16.msra.mxu1 %v4559_v24 }
 0x237   : > { %2646 = vmatprep.subr.bf16.mxu0 %v4564_v25  ;;  %2728 = vmatprep.subr.bf16.mxu1 %v4567_v26 }
 0x23a   : > { %2647 = vmatpush1.bf16.msra.mxu0 %v4562_v27  ;;  %2729 = vmatpush1.bf16.msra.mxu1 %v4565_v28 }
 0x23b   : > { %2648 = vmatprep.subr.bf16.mxu0 %v4570_v30  ;;  %2730 = vmatprep.subr.bf16.mxu1 %v4573_v31 }
 0x23e   : > { %2649 = vmatpush1.bf16.msra.mxu0 %v4568_v32  ;;  %2731 = vmatpush1.bf16.msra.mxu1 %v4571_v33 }
 0x23f   : > { %2650 = vmatprep.subr.bf16.mxu0 %v4576_v35  ;;  %2732 = vmatprep.subr.bf16.mxu1 %v4579_v36 }
 0x242   : > { %2651 = vmatpush1.bf16.msra.mxu0 %v4574_v38  ;;  %2733 = vmatpush1.bf16.msra.mxu1 %v4577_v39  ;;  %v4640_v38 = vld [vmem:[#allocation9 + $0x200] ss:$16 sps:$4 sm:$0xff]   ;;  %v4643_v39 = vld [vmem:[#allocation9 + $0x208] ss:$16 sps:$4 sm:$0xff]  }
 0x243   : > { %2652 = vmatprep.subr.bf16.mxu0 %v4582_v40  ;;  %2734 = vmatprep.subr.bf16.mxu1 %v4585_v41  ;;  %v4648_v41 = vld [vmem:[#allocation9 + $0x224] ss:$16 sps:$4 sm:$0xff]  }
 0x246   : > { %2653 = vmatpush1.bf16.msra.mxu0 %v4580_v42  ;;  %2735 = vmatpush1.bf16.msra.mxu1 %v4583_v43  ;;  %v4651_v42 = vld [vmem:[#allocation9 + $0x22c] ss:$16 sps:$4 sm:$0xff]  }
 0x247   : > { %2654 = vmatprep.subr.bf16.mxu0 %v4588_v44  ;;  %2736 = vmatprep.subr.bf16.mxu1 %v4591_v45  ;;  %v4646_v44 = vld [vmem:[#allocation9 + $0x220] ss:$16 sps:$4 sm:$0xff]   ;;  %v4649_v45 = vld [vmem:[#allocation9 + $0x228] ss:$16 sps:$4 sm:$0xff]  }
 0x24a   : > { %2655 = vmatpush1.bf16.msra.mxu0 %v4586_v46  ;;  %2737 = vmatpush1.bf16.msra.mxu1 %v4589_v47  ;;  %v4654_v46 = vld [vmem:[#allocation9 + $0x244] ss:$16 sps:$4 sm:$0xff]   ;;  %v4657_v47 = vld [vmem:[#allocation9 + $0x24c] ss:$16 sps:$4 sm:$0xff]  }
 0x24b   : > { %2656 = vmatprep.subr.bf16.mxu0 %v4594_v48  ;;  %2738 = vmatprep.subr.bf16.mxu1 %v4597_v49  ;;  %v4652_v48 = vld [vmem:[#allocation9 + $0x240] ss:$16 sps:$4 sm:$0xff]   ;;  %v4655_v49 = vld [vmem:[#allocation9 + $0x248] ss:$16 sps:$4 sm:$0xff]  }
 0x24e   : > { %2657 = vmatpush1.bf16.msra.mxu0 %v4592_v51  ;;  %2739 = vmatpush1.bf16.msra.mxu1 %v4595_v52  ;;  %v4660_v51 = vld [vmem:[#allocation9 + $0x264] ss:$16 sps:$4 sm:$0xff]   ;;  %v4663_v52 = vld [vmem:[#allocation9 + $0x26c] ss:$16 sps:$4 sm:$0xff]  }
 0x24f   : > { %2658 = vmatprep.subr.bf16.mxu0 %v4600_v53  ;;  %2740 = vmatprep.subr.bf16.mxu1 %v4603_v54  ;;  %v4658_v53 = vld [vmem:[#allocation9 + $0x260] ss:$16 sps:$4 sm:$0xff]   ;;  %v4661_v54 = vld [vmem:[#allocation9 + $0x268] ss:$16 sps:$4 sm:$0xff]  }
 0x252   : > { %2659 = vmatpush1.bf16.msra.mxu0 %v4598_v55  ;;  %2741 = vmatpush1.bf16.msra.mxu1 %v4601_v56  ;;  %v4666_v55 = vld [vmem:[#allocation9 + $0x284] ss:$16 sps:$4 sm:$0xff]   ;;  %v4669_v56 = vld [vmem:[#allocation9 + $0x28c] ss:$16 sps:$4 sm:$0xff]  }
 0x253   : > { %2660 = vmatprep.subr.bf16.mxu0 %v4606_v57  ;;  %2742 = vmatprep.subr.bf16.mxu1 %v4609_v58  ;;  %v4664_v57 = vld [vmem:[#allocation9 + $0x280] ss:$16 sps:$4 sm:$0xff]   ;;  %v4667_v58 = vld [vmem:[#allocation9 + $0x288] ss:$16 sps:$4 sm:$0xff]  }
 0x256   : > { %2661 = vmatpush1.bf16.msra.mxu0 %v4604_v59  ;;  %2743 = vmatpush1.bf16.msra.mxu1 %v4607_v60  ;;  %v4672_v59 = vld [vmem:[#allocation9 + $0x2a4] ss:$16 sps:$4 sm:$0xff]   ;;  %v4675_v60 = vld [vmem:[#allocation9 + $0x2ac] ss:$16 sps:$4 sm:$0xff]  }
 0x257   : > { %2662 = vmatprep.subr.bf16.mxu0 %v4612_v61  ;;  %2744 = vmatprep.subr.bf16.mxu1 %v4615_v62  ;;  %v4670_v61 = vld [vmem:[#allocation9 + $0x2a0] ss:$16 sps:$4 sm:$0xff]   ;;  %v4673_v62 = vld [vmem:[#allocation9 + $0x2a8] ss:$16 sps:$4 sm:$0xff]  }
 0x25a   : > { %2663 = vmatpush1.bf16.msra.mxu0 %v4610_v63  ;;  %2745 = vmatpush1.bf16.msra.mxu1 %v4613_v1  ;;  %v4678_v63 = vld [vmem:[#allocation9 + $0x2c4] ss:$16 sps:$4 sm:$0xff]   ;;  %v4681_v1 = vld [vmem:[#allocation9 + $0x2cc] ss:$16 sps:$4 sm:$0xff]  }
 0x25b   : > { %2664 = vmatprep.subr.bf16.mxu0 %v4618_v2  ;;  %2746 = vmatprep.subr.bf16.mxu1 %v4621_v3  ;;  %v4676_v2 = vld [vmem:[#allocation9 + $0x2c0] ss:$16 sps:$4 sm:$0xff]   ;;  %v4679_v3 = vld [vmem:[#allocation9 + $0x2c8] ss:$16 sps:$4 sm:$0xff]  }
 0x25e   : > { %2665 = vmatpush1.bf16.msra.mxu0 %v4616_v4  ;;  %2747 = vmatpush1.bf16.msra.mxu1 %v4619_v5  ;;  %v4684_v4 = vld [vmem:[#allocation9 + $0x2e4] ss:$16 sps:$4 sm:$0xff]   ;;  %v4687_v5 = vld [vmem:[#allocation9 + $0x2ec] ss:$16 sps:$4 sm:$0xff]  }
 0x25f   : > { %2666 = vmatprep.subr.bf16.mxu0 %v4624_v6  ;;  %2748 = vmatprep.subr.bf16.mxu1 %v4627_v7  ;;  %v4682_v6 = vld [vmem:[#allocation9 + $0x2e0] ss:$16 sps:$4 sm:$0xff]   ;;  %v4685_v7 = vld [vmem:[#allocation9 + $0x2e8] ss:$16 sps:$4 sm:$0xff]  }
 0x262   : > { %2667 = vmatpush1.bf16.msra.mxu0 %v4622_v8  ;;  %2749 = vmatpush1.bf16.msra.mxu1 %v4625_v29  ;;  %v4690_v8 = vld [vmem:[#allocation9 + $0x304] ss:$16 sps:$4 sm:$0xff]   ;;  %v4693_v29 = vld [vmem:[#allocation9 + $0x30c] ss:$16 sps:$4 sm:$0xff]  }
 0x263   : > { %2668 = vmatprep.subr.bf16.mxu0 %v4630_v9  ;;  %2750 = vmatprep.subr.bf16.mxu1 %v4633_v10  ;;  %v4688_v9 = vld [vmem:[#allocation9 + $0x300] ss:$16 sps:$4 sm:$0xff]   ;;  %v4691_v10 = vld [vmem:[#allocation9 + $0x308] ss:$16 sps:$4 sm:$0xff]  }
 0x266   : > { %2669 = vmatpush1.bf16.msra.mxu0 %v4628_v11  ;;  %2751 = vmatpush1.bf16.msra.mxu1 %v4631_v12  ;;  %v4696_v11 = vld [vmem:[#allocation9 + $0x324] ss:$16 sps:$4 sm:$0xff]   ;;  %v4699_v12 = vld [vmem:[#allocation9 + $0x32c] ss:$16 sps:$4 sm:$0xff]  }
 0x267   : > { %2670 = vmatprep.subr.bf16.mxu0 %v4636_v13  ;;  %2752 = vmatprep.subr.bf16.mxu1 %v4639_v14  ;;  %v4694_v13 = vld [vmem:[#allocation9 + $0x320] ss:$16 sps:$4 sm:$0xff]   ;;  %v4697_v14 = vld [vmem:[#allocation9 + $0x328] ss:$16 sps:$4 sm:$0xff]  }
 0x26a   : > { %2671 = vmatpush1.bf16.msra.mxu0 %v4634_v15  ;;  %2753 = vmatpush1.bf16.msra.mxu1 %v4637_v16  ;;  %v4702_v15 = vld [vmem:[#allocation9 + $0x344] ss:$16 sps:$4 sm:$0xff]   ;;  %v4705_v16 = vld [vmem:[#allocation9 + $0x34c] ss:$16 sps:$4 sm:$0xff]  }
 0x26b   : > { %2681 = vmatprep.subr.bf16.mxu0 %v4642_v37  ;;  %2763 = vmatprep.subr.bf16.mxu1 %v4645_v17  ;;  %v4700_v37 = vld [vmem:[#allocation9 + $0x340] ss:$16 sps:$4 sm:$0xff]   ;;  %v4703_v17 = vld [vmem:[#allocation9 + $0x348] ss:$16 sps:$4 sm:$0xff]  }
 0x300   : > { %v1757_v23 = vpop.f32.mrb[0].mxu0  ;;  %v5602_v24 = vpop.f32.mrb[0].mxu1 }
 0x301   : > { %v4162_v25 = vadd.f32 %v1757_v23, %v1025_v20  ;;  %v1759_v26 = vpop.f32.mrb[1].mxu0  ;;  %v1841_v27 = vpop.f32.mrb[1].mxu1  ;;  %v4708_v20 = vld [vmem:[#allocation9 + $0x364] ss:$16 sps:$4 sm:$0xff]   ;;  %v4709_v23 = vld [vmem:[#allocation9 + $0x368] ss:$16 sps:$4 sm:$0xff]  }
 0x302   : > { %v4163_v28 = vadd.f32 %v1759_v26, %v1029_v21  ;;  %v1761_v30 = vpop.f32.mrb[2].mxu0  ;;  %v1843_v31 = vpop.f32.mrb[2].mxu1  ;;  %v4165_v32 = vadd.f32 %v1841_v27, %v1037_v22  ;;  %v4711_v21 = vld [vmem:[#allocation9 + $0x36c] ss:$16 sps:$4 sm:$0xff]   ;;  %v4706_v22 = vld [vmem:[#allocation9 + $0x360] ss:$16 sps:$4 sm:$0xff]  }
 0x303   : > { %v1762_v33 = vpop.f32.mrb[3].mxu0  ;;  %v1844_v35 = vpop.f32.mrb[3].mxu1  ;;  %v1975_v40 = vpack.c.bf16 %v4162_v25, %v4162_v25  ;;  %v4714_v25 = vld [vmem:[#allocation9 + $0x384] ss:$16 sps:$4 sm:$0xff]   ;;  %v4717_v26 = vld [vmem:[#allocation9 + $0x38c] ss:$16 sps:$4 sm:$0xff]  }
 0x304   : > { %v1976_v36 = vpack.c.bf16 %v4163_v28, %v4163_v28  ;;  %v1978_v43 = vpack.c.bf16 %v4165_v32, %v4165_v32  ;;  %v4712_v27 = vld [vmem:[#allocation9 + $0x380] ss:$16 sps:$4 sm:$0xff]   ;;  %v4715_v28 = vld [vmem:[#allocation9 + $0x388] ss:$16 sps:$4 sm:$0xff]   ;;  %v4720_v30 = vld [vmem:[#allocation9 + $0x3a4] ss:$16 sps:$4 sm:$0xff]  }
 0x305   : > { %v4723_v31 = vld [vmem:[#allocation9 + $0x3ac] ss:$16 sps:$4 sm:$0xff]   ;;  %v4718_v32 = vld [vmem:[#allocation9 + $0x3a0] ss:$16 sps:$4 sm:$0xff]   ;;  %v4721_v33 = vld [vmem:[#allocation9 + $0x3a8] ss:$16 sps:$4 sm:$0xff]  }
 0x306   : > { %2672 = vmatprep.mubr.bf16.mxu0 %v1976_v36  ;;  %2754 = vmatprep.mubr.bf16.mxu1 %v1976_v36  ;;  %v4726_v35 = vld [vmem:[#allocation9 + $0x3c4] ss:$16 sps:$4 sm:$0xff]   ;;  %v4729_v36 = vld [vmem:[#allocation9 + $0x3cc] ss:$16 sps:$4 sm:$0xff]  }
 0x307   : > { %2673 = vmatmul.mubr.bf16.vlgmr.msra.gmra.mrb[4].mxu0 %v1975_v40  ;;  %2755 = vmatmul.mubr.bf16.vlgmr.msra.gmra.mrb[4].mxu1 %v1975_v40  ;;  %v1033_v40 = vrot.slane %v5594_v18, %v5587_v0  ;;  %v4739_v18 = vld [vmem:[#allocation11 + $0x10] ss:$8 sps:$4 sm:$0xff]  }
 0x308   : > { %2682 = vmatpush1.bf16.msra.mxu0 %v4640_v38  ;;  %2764 = vmatpush1.bf16.msra.mxu1 %v4643_v39  ;;  %v4724_v38 = vld [vmem:[#allocation9 + $0x3c0] ss:$16 sps:$4 sm:$0xff]   ;;  %v4727_v39 = vld [vmem:[#allocation9 + $0x3c8] ss:$16 sps:$4 sm:$0xff]  }
 0x309   : > { %2713 = vmatprep.mubr.bf16.mxu0 %v1978_v43  ;;  %2795 = vmatprep.mubr.bf16.mxu1 %v1978_v43  ;;  %v4730_v43 = vld [vmem:[#allocation9 + $0x3e0] ss:$16 sps:$4 sm:$0xff]  }
 0x30a   : > { %2683 = vmatprep.subr.bf16.mxu0 %v4648_v41  ;;  %2765 = vmatprep.subr.bf16.mxu1 %v4651_v42  ;;  %v4732_v41 = vld [vmem:[#allocation9 + $0x3e4] ss:$16 sps:$4 sm:$0xff]   ;;  %v4735_v42 = vld [vmem:[#allocation9 + $0x3ec] ss:$16 sps:$4 sm:$0xff]  }
 0x30c   : > { %2684 = vmatpush1.bf16.msra.mxu0 %v4646_v44  ;;  %2766 = vmatpush1.bf16.msra.mxu1 %v4649_v45  ;;  %v4733_v44 = vld [vmem:[#allocation9 + $0x3e8] ss:$16 sps:$4 sm:$0xff]   ;;  %v4164_v45 = vadd.f32 %v5602_v24, %v1033_v40 }
 0x30d   : > { %2685 = vmatprep.subr.bf16.mxu0 %v4654_v46  ;;  %2767 = vmatprep.subr.bf16.mxu1 %v4657_v47  ;;  %v4738_v46 = vld [vmem:[#allocation11 + $0x4] ss:$8 sps:$4 sm:$0xff]   ;;  %v4736_v47 = vld [vmem:[#allocation11] ss:$8 sps:$4 sm:$0xff]   ;;  %v4745_v24 = vld [vmem:[#allocation11 + $0x30] ss:$8 sps:$4 sm:$0xff]  }
 0x310   : > { %2686 = vmatpush1.bf16.msra.mxu0 %v4652_v48  ;;  %2768 = vmatpush1.bf16.msra.mxu1 %v4655_v49  ;;  %v1977_v48 = vpack.c.bf16 %v4164_v45, %v4164_v45  ;;  %v4741_v49 = vld [vmem:[#allocation11 + $0x14] ss:$8 sps:$4 sm:$0xff]  }
 0x311   : > { %2687 = vmatprep.subr.bf16.mxu0 %v4660_v51  ;;  %2769 = vmatprep.subr.bf16.mxu1 %v4663_v52  ;;  %v4744_v51 = vld [vmem:[#allocation11 + $0x24] ss:$8 sps:$4 sm:$0xff]   ;;  %v4742_v52 = vld [vmem:[#allocation11 + $0x20] ss:$8 sps:$4 sm:$0xff]  }
 0x314   : > { %2688 = vmatpush1.bf16.msra.mxu0 %v4658_v53  ;;  %2770 = vmatpush1.bf16.msra.mxu1 %v4661_v54  ;;  %v4747_v53 = vld [vmem:[#allocation11 + $0x34] ss:$8 sps:$4 sm:$0xff]   ;;  %v4750_v54 = vld [vmem:[#allocation11 + $0x44] ss:$8 sps:$4 sm:$0xff]  }
 0x315   : > { %2689 = vmatprep.subr.bf16.mxu0 %v4666_v55  ;;  %2771 = vmatprep.subr.bf16.mxu1 %v4669_v56  ;;  %v4748_v55 = vld [vmem:[#allocation11 + $0x40] ss:$8 sps:$4 sm:$0xff]   ;;  %v4753_v56 = vld [vmem:[#allocation11 + $0x54] ss:$8 sps:$4 sm:$0xff]  }
 0x318   : > { %2690 = vmatpush1.bf16.msra.mxu0 %v4664_v57  ;;  %2772 = vmatpush1.bf16.msra.mxu1 %v4667_v58  ;;  %v4751_v57 = vld [vmem:[#allocation11 + $0x50] ss:$8 sps:$4 sm:$0xff]   ;;  %v4756_v58 = vld [vmem:[#allocation11 + $0x64] ss:$8 sps:$4 sm:$0xff]  }
 0x319   : > { %2691 = vmatprep.subr.bf16.mxu0 %v4672_v59  ;;  %2773 = vmatprep.subr.bf16.mxu1 %v4675_v60  ;;  %v4754_v59 = vld [vmem:[#allocation11 + $0x60] ss:$8 sps:$4 sm:$0xff]   ;;  %v4759_v60 = vld [vmem:[#allocation11 + $0x74] ss:$8 sps:$4 sm:$0xff]  }
 0x31c   : > { %2692 = vmatpush1.bf16.msra.mxu0 %v4670_v61  ;;  %2774 = vmatpush1.bf16.msra.mxu1 %v4673_v62  ;;  %v4757_v61 = vld [vmem:[#allocation11 + $0x70] ss:$8 sps:$4 sm:$0xff]   ;;  %v4762_v62 = vld [vmem:[#allocation11 + $0x84] ss:$8 sps:$4 sm:$0xff]  }
 0x31d   : > { %2693 = vmatprep.subr.bf16.mxu0 %v4678_v63  ;;  %2775 = vmatprep.subr.bf16.mxu1 %v4681_v1  ;;  %v4760_v63 = vld [vmem:[#allocation11 + $0x80] ss:$8 sps:$4 sm:$0xff]   ;;  %v4765_v1 = vld [vmem:[#allocation11 + $0x94] ss:$8 sps:$4 sm:$0xff]  }
 0x320   : > { %2694 = vmatpush1.bf16.msra.mxu0 %v4676_v2  ;;  %2776 = vmatpush1.bf16.msra.mxu1 %v4679_v3  ;;  %v4763_v2 = vld [vmem:[#allocation11 + $0x90] ss:$8 sps:$4 sm:$0xff]   ;;  %v4768_v3 = vld [vmem:[#allocation11 + $0xa4] ss:$8 sps:$4 sm:$0xff]  }
 0x321   : > { %2695 = vmatprep.subr.bf16.mxu0 %v4684_v4  ;;  %2777 = vmatprep.subr.bf16.mxu1 %v4687_v5  ;;  %v4766_v4 = vld [vmem:[#allocation11 + $0xa0] ss:$8 sps:$4 sm:$0xff]   ;;  %v4771_v5 = vld [vmem:[#allocation11 + $0xb4] ss:$8 sps:$4 sm:$0xff]  }
 0x324   : > { %2696 = vmatpush1.bf16.msra.mxu0 %v4682_v6  ;;  %2778 = vmatpush1.bf16.msra.mxu1 %v4685_v7  ;;  %v4769_v6 = vld [vmem:[#allocation11 + $0xb0] ss:$8 sps:$4 sm:$0xff]   ;;  %v4774_v7 = vld [vmem:[#allocation11 + $0xc4] ss:$8 sps:$4 sm:$0xff]  }
 0x325   : > { %2697 = vmatprep.subr.bf16.mxu0 %v4690_v8  ;;  %2779 = vmatprep.subr.bf16.mxu1 %v4693_v29  ;;  %v4772_v8 = vld [vmem:[#allocation11 + $0xc0] ss:$8 sps:$4 sm:$0xff]   ;;  %v4777_v29 = vld [vmem:[#allocation11 + $0xd4] ss:$8 sps:$4 sm:$0xff]  }
 0x328   : > { %2698 = vmatpush1.bf16.msra.mxu0 %v4688_v9  ;;  %2780 = vmatpush1.bf16.msra.mxu1 %v4691_v10  ;;  %v4775_v9 = vld [vmem:[#allocation11 + $0xd0] ss:$8 sps:$4 sm:$0xff]   ;;  %v4780_v10 = vld [vmem:[#allocation11 + $0xe4] ss:$8 sps:$4 sm:$0xff]  }
 0x329   : > { %2699 = vmatprep.subr.bf16.mxu0 %v4696_v11  ;;  %2781 = vmatprep.subr.bf16.mxu1 %v4699_v12  ;;  %v4778_v11 = vld [vmem:[#allocation11 + $0xe0] ss:$8 sps:$4 sm:$0xff]   ;;  %v4783_v12 = vld [vmem:[#allocation11 + $0xf4] ss:$8 sps:$4 sm:$0xff]  }
 0x32c   : > { %2700 = vmatpush1.bf16.msra.mxu0 %v4694_v13  ;;  %2782 = vmatpush1.bf16.msra.mxu1 %v4697_v14  ;;  %v4781_v13 = vld [vmem:[#allocation11 + $0xf0] ss:$8 sps:$4 sm:$0xff]   ;;  %v4786_v14 = vld [vmem:[#allocation11 + $0x104] ss:$8 sps:$4 sm:$0xff]  }
 0x32d   : > { %2701 = vmatprep.subr.bf16.mxu0 %v4702_v15  ;;  %2783 = vmatprep.subr.bf16.mxu1 %v4705_v16  ;;  %v4832_v15 = vld [vmem:[#allocation12 + $0x40] sm:$0xff]  }
 0x32e   : > { %v4833_v16 = vld [vmem:[#allocation12] sm:$0xff]  }
 0x330   : > { %2702 = vmatpush1.bf16.msra.mxu0 %v4700_v37  ;;  %2784 = vmatpush1.bf16.msra.mxu1 %v4703_v17  ;;  %v4834_v37 = vld [vmem:[#allocation12 + $0x48] sm:$0xff]  }
 0x331   : > { %2703 = vmatprep.subr.bf16.mxu0 %v4708_v20  ;;  %2785 = vmatprep.subr.bf16.mxu1 %v4711_v21  ;;  %v4835_v17 = vld [vmem:[#allocation12 + $0x8] sm:$0xff]   ;;  %v4836_v20 = vld [vmem:[#allocation12 + $0x50] sm:$0xff]  }
 0x332   : > { %v4837_v21 = vld [vmem:[#allocation12 + $0x10] sm:$0xff]  }
 0x334   : > { %2704 = vmatpush1.bf16.msra.mxu0 %v4706_v22  ;;  %2786 = vmatpush1.bf16.msra.mxu1 %v4709_v23  ;;  %v4838_v22 = vld [vmem:[#allocation12 + $0x58] sm:$0xff]  }
 0x335   : > { %2705 = vmatprep.subr.bf16.mxu0 %v4714_v25  ;;  %2787 = vmatprep.subr.bf16.mxu1 %v4717_v26  ;;  %v4839_v23 = vld [vmem:[#allocation12 + $0x18] sm:$0xff]   ;;  %v4840_v25 = vld [vmem:[#allocation12 + $0x60] sm:$0xff]  }
 0x336   : > { %v4841_v26 = vld [vmem:[#allocation12 + $0x20] sm:$0xff]  }
 0x338   : > { %2706 = vmatpush1.bf16.msra.mxu0 %v4712_v27  ;;  %2788 = vmatpush1.bf16.msra.mxu1 %v4715_v28  ;;  %v4842_v27 = vld [vmem:[#allocation12 + $0x68] sm:$0xff]  }
 0x339   : > { %2707 = vmatprep.subr.bf16.mxu0 %v4720_v30  ;;  %2789 = vmatprep.subr.bf16.mxu1 %v4723_v31  ;;  %v4843_v28 = vld [vmem:[#allocation12 + $0x28] sm:$0xff]   ;;  %v4844_v30 = vld [vmem:[#allocation12 + $0x70] sm:$0xff]   ;;  %v5610_v31 = vld [vmem:[%s5716_s16] sm:$0xf] }
 0x33c   : > { %2708 = vmatpush1.bf16.msra.mxu0 %v4718_v32  ;;  %2790 = vmatpush1.bf16.msra.mxu1 %v4721_v33  ;;  %v1983_v32 = vrot.slane %v5610_v31, %v5577_v50  ;;  %v1987_v33 = vrot.slane %v5610_v31, %v5567_v34 }
 0x33d   : > { %2709 = vmatprep.subr.bf16.mxu0 %v4726_v35  ;;  %2791 = vmatprep.subr.bf16.mxu1 %v4729_v36  ;;  %v1995_v35 = vrot.slane %v5610_v31, %v5582_v19  ;;  %v4787_v19 = vld [vmem:[#allocation11 + $0x110] ss:$8 sps:$4 sm:$0xff]  }
 0x340   : > { %2710 = vmatpush1.bf16.msra.mxu0 %v4724_v38  ;;  %2792 = vmatpush1.bf16.msra.mxu1 %v4727_v39 }
 0x341   : > { %2711 = vmatprep.subr.bf16.mxu0 %v4732_v41  ;;  %2793 = vmatprep.subr.bf16.mxu1 %v4735_v42 }
 0x344   : > { %2712 = vmatpush1.bf16.msra.mxu0 %v4730_v43  ;;  %2794 = vmatpush1.bf16.msra.mxu1 %v4733_v44 }
 0x345   : > { %3204 = vmatprep.subr.bf16.mxu0 %v4738_v46  ;;  %4111 = vmatprep.subr.bf16.mxu1 %v4832_v15  ;;  %v4831_v15 = vld [vmem:[#allocation11 + $0x1f4] ss:$8 sps:$4 sm:$0xff]  }
 0x347   : > { %2714 = vmatmul.mubr.bf16.vlgmr.msra.gmra.mrb[4].mxu0 %v1977_v48  ;;  %2796 = vmatmul.mubr.bf16.vlgmr.msra.gmra.mrb[4].mxu1 %v1977_v48 }
 0x348   : > { %3205 = vmatpush1.bf16.msra.mxu0 %v4736_v47  ;;  %4112 = vmatpush3.bf16.msra.mxu1 %v4833_v16  ;;  %v4829_v16 = vld [vmem:[#allocation11 + $0x1f0] ss:$8 sps:$4 sm:$0xff]  }
 0x349   : > { %3206 = vmatprep.subr.bf16.mxu0 %v4741_v49  ;;  %4113 = vmatprep.subr.bf16.mxu1 %v4834_v37  ;;  %v4784_v49 = vld [vmem:[#allocation11 + $0x100] ss:$8 sps:$4 sm:$0xff]  }
 0x34c   : > { %3207 = vmatpush1.bf16.msra.mxu0 %v4739_v18  ;;  %4114 = vmatpush3.bf16.msra.mxu1 %v4835_v17 }
 0x34d   : > { %3208 = vmatprep.subr.bf16.mxu0 %v4744_v51  ;;  %4115 = vmatprep.subr.bf16.mxu1 %v4836_v20  ;;  %v4789_v51 = vld [vmem:[#allocation11 + $0x114] ss:$8 sps:$4 sm:$0xff]  }
 0x34e   : > { %v4845_v20 = vld [vmem:[#allocation12 + $0x30] sm:$0xff]  }
 0x350   : > { %3209 = vmatpush1.bf16.msra.mxu0 %v4742_v52  ;;  %4116 = vmatpush3.bf16.msra.mxu1 %v4837_v21  ;;  %v4846_v21 = vld [vmem:[#allocation12 + $0x78] sm:$0xff]  }
 0x351   : > { %3210 = vmatprep.subr.bf16.mxu0 %v4747_v53  ;;  %4117 = vmatprep.subr.bf16.mxu1 %v4838_v22  ;;  %v4792_v53 = vld [vmem:[#allocation11 + $0x124] ss:$8 sps:$4 sm:$0xff]   ;;  %v4847_v22 = vld [vmem:[#allocation12 + $0x38] sm:$0xff]  }
 0x354   : > { %3211 = vmatpush1.bf16.msra.mxu0 %v4745_v24  ;;  %4118 = vmatpush3.bf16.msra.mxu1 %v4839_v23  ;;  %v4790_v24 = vld [vmem:[#allocation11 + $0x120] ss:$8 sps:$4 sm:$0xff]   ;;  %v5153_v23 = vmov 0.0  }
 0x355   : > { %3212 = vmatprep.subr.bf16.mxu0 %v4750_v54  ;;  %4119 = vmatprep.subr.bf16.mxu1 %v4840_v25  ;;  %v4795_v54 = vld [vmem:[#allocation11 + $0x134] ss:$8 sps:$4 sm:$0xff]  }
 0x358   : > { %3213 = vmatpush1.bf16.msra.mxu0 %v4748_v55  ;;  %4120 = vmatpush3.bf16.msra.mxu1 %v4841_v26  ;;  %v4793_v55 = vld [vmem:[#allocation11 + $0x130] ss:$8 sps:$4 sm:$0xff]  }
 0x359   : > { %3214 = vmatprep.subr.bf16.mxu0 %v4753_v56  ;;  %4121 = vmatprep.subr.bf16.mxu1 %v4842_v27  ;;  %v4798_v56 = vld [vmem:[#allocation11 + $0x144] ss:$8 sps:$4 sm:$0xff]  }
 0x35c   : > { %3215 = vmatpush1.bf16.msra.mxu0 %v4751_v57  ;;  %4122 = vmatpush3.bf16.msra.mxu1 %v4843_v28  ;;  %v4796_v57 = vld [vmem:[#allocation11 + $0x140] ss:$8 sps:$4 sm:$0xff]  }
 0x35d   : > { %3216 = vmatprep.subr.bf16.mxu0 %v4756_v58  ;;  %4123 = vmatprep.subr.bf16.mxu1 %v4844_v30  ;;  %v4801_v58 = vld [vmem:[#allocation11 + $0x154] ss:$8 sps:$4 sm:$0xff]  }
 0x360   : > { %3217 = vmatpush1.bf16.msra.mxu0 %v4754_v59  ;;  %v4799_v59 = vld [vmem:[#allocation11 + $0x150] ss:$8 sps:$4 sm:$0xff]   ;;  %4124 = vmatpush3.bf16.msra.mxu1 %v4845_v20 }
 0x361   : > { %3218 = vmatprep.subr.bf16.mxu0 %v4759_v60  ;;  %v4804_v60 = vld [vmem:[#allocation11 + $0x164] ss:$8 sps:$4 sm:$0xff]   ;;  %4125 = vmatprep.subr.bf16.mxu1 %v4846_v21 }
 0x364   : > { %3219 = vmatpush1.bf16.msra.mxu0 %v4757_v61  ;;  %v4802_v61 = vld [vmem:[#allocation11 + $0x160] ss:$8 sps:$4 sm:$0xff]   ;;  %4126 = vmatpush3.bf16.msra.mxu1 %v4847_v22 }
 0x365   : > { %3220 = vmatprep.subr.bf16.mxu0 %v4762_v62  ;;  %v4807_v62 = vld [vmem:[#allocation11 + $0x174] ss:$8 sps:$4 sm:$0xff]   ;;  %4142 = vmatprep.subr.bf16.mxu1 %v5153_v23 }
 0x368   : > { %3221 = vmatpush1.bf16.msra.mxu0 %v4760_v63  ;;  %v4805_v63 = vld [vmem:[#allocation11 + $0x170] ss:$8 sps:$4 sm:$0xff]  }
 0x369   : > { %3222 = vmatprep.subr.bf16.mxu0 %v4765_v1  ;;  %v4810_v1 = vld [vmem:[#allocation11 + $0x184] ss:$8 sps:$4 sm:$0xff]  }
 0x36c   : > { %3223 = vmatpush1.bf16.msra.mxu0 %v4763_v2  ;;  %v4808_v2 = vld [vmem:[#allocation11 + $0x180] ss:$8 sps:$4 sm:$0xff]  }
 0x36d   : > { %3224 = vmatprep.subr.bf16.mxu0 %v4768_v3  ;;  %v4813_v3 = vld [vmem:[#allocation11 + $0x194] ss:$8 sps:$4 sm:$0xff]  }
 0x370   : > { %3225 = vmatpush1.bf16.msra.mxu0 %v4766_v4  ;;  %v4811_v4 = vld [vmem:[#allocation11 + $0x190] ss:$8 sps:$4 sm:$0xff]  }
 0x371   : > { %3226 = vmatprep.subr.bf16.mxu0 %v4771_v5  ;;  %v4816_v5 = vld [vmem:[#allocation11 + $0x1a4] ss:$8 sps:$4 sm:$0xff]  }
 0x374   : > { %3227 = vmatpush1.bf16.msra.mxu0 %v4769_v6  ;;  %v4814_v6 = vld [vmem:[#allocation11 + $0x1a0] ss:$8 sps:$4 sm:$0xff]  }
 0x375   : > { %3228 = vmatprep.subr.bf16.mxu0 %v4774_v7  ;;  %v4819_v7 = vld [vmem:[#allocation11 + $0x1b4] ss:$8 sps:$4 sm:$0xff]  }
 0x378   : > { %3229 = vmatpush1.bf16.msra.mxu0 %v4772_v8  ;;  %v4817_v8 = vld [vmem:[#allocation11 + $0x1b0] ss:$8 sps:$4 sm:$0xff]  }
 0x379   : > { %3230 = vmatprep.subr.bf16.mxu0 %v4777_v29  ;;  %v4822_v29 = vld [vmem:[#allocation11 + $0x1c4] ss:$8 sps:$4 sm:$0xff]  }
 0x37c   : > { %3231 = vmatpush1.bf16.msra.mxu0 %v4775_v9  ;;  %v4820_v9 = vld [vmem:[#allocation11 + $0x1c0] ss:$8 sps:$4 sm:$0xff]  }
 0x37d   : > { %3232 = vmatprep.subr.bf16.mxu0 %v4780_v10  ;;  %v4825_v10 = vld [vmem:[#allocation11 + $0x1d4] ss:$8 sps:$4 sm:$0xff]  }
 0x380   : > { %3233 = vmatpush1.bf16.msra.mxu0 %v4778_v11  ;;  %v4823_v11 = vld [vmem:[#allocation11 + $0x1d0] ss:$8 sps:$4 sm:$0xff]  }
 0x381   : > { %3234 = vmatprep.subr.bf16.mxu0 %v4783_v12  ;;  %v4828_v12 = vld [vmem:[#allocation11 + $0x1e4] ss:$8 sps:$4 sm:$0xff]  }
 0x384   : > { %3235 = vmatpush1.bf16.msra.mxu0 %v4781_v13  ;;  %v4826_v13 = vld [vmem:[#allocation11 + $0x1e0] ss:$8 sps:$4 sm:$0xff]  }
 0x385   : > { %3245 = vmatprep.subr.bf16.mxu0 %v4786_v14  ;;  %v1991_v14 = vrot.slane %v5610_v31, %v5587_v0  ;;  %v2868_v0 = vld [vmem:[%s5717_s22] sm:$0x3] }
 0x386   : > { %v2877_v25 = vrot.slane %v2868_v0, %v5577_v50  ;;  %v2881_v26 = vrot.slane %v2868_v0, %v5567_v34  ;;  %v4851_v50 = vld [vmem:[#allocation14 + $0x18] sm:$0xff]   ;;  %v4852_v34 = vld [vmem:[#allocation14 + $0x20] sm:$0xff]  }
 0x41a   : > { %v2715_v36 = vpop.f32.mrb[4].mxu0  ;;  %v5618_v38 = vpop.f32.mrb[4].mxu1 }
 0x41b   : > { %v4166_v39 = vadd.f32 %v2715_v36, %v1983_v32  ;;  %v2717_v40 = vpop.f32.mrb[5].mxu0  ;;  %v2799_v41 = vpop.f32.mrb[5].mxu1  ;;  %v4168_v37 = vadd.f32 %v5618_v38, %v1991_v14  ;;  %v4848_v36 = vld [vmem:[#allocation14] sm:$0xff]  }
 0x41c   : > { %v4167_v42 = vadd.f32 %v2717_v40, %v1987_v33  ;;  %v4169_v43 = vadd.f32 %v2799_v41, %v1995_v35  ;;  %v2719_v44 = vpop.f32.mrb[6].mxu0  ;;  %v2801_v45 = vpop.f32.mrb[6].mxu1  ;;  %v4850_v40 = vld [vmem:[#allocation14 + $0x10] sm:$0xff]   ;;  %v4853_v41 = vld [vmem:[#allocation14 + $0x28] sm:$0xff]  }
 0x41d   : > { %v2720_v46 = vpop.f32.mrb[7].mxu0  ;;  %v2802_v47 = vpop.f32.mrb[7].mxu1  ;;  %v2869_v18 = vpack.c.bf16 %v4166_v39, %v4166_v39  ;;  %v2871_v17 = vpack.c.bf16 %v4168_v37, %v4168_v37  ;;  %v4849_v39 = vld [vmem:[#allocation14 + $0x8] sm:$0xff]   ;;  %v4079_v45 = vld [vmem:[%s5718_s25] ss:$0 sm:$0xff] }
 0x41e   : > { %v2870_v48 = vpack.c.bf16 %v4167_v42, %v4167_v42  ;;  %v2872_v52 = vpack.c.bf16 %v4169_v43, %v4169_v43  ;;  %v4854_v42 = vld [vmem:[#allocation14 + $0x30] sm:$0xff]   ;;  %v4855_v43 = vld [vmem:[#allocation14 + $0x38] sm:$0xff]  }
 0x420   : > { %3236 = vmatprep.mubr.bf16.mxu0 %v2870_v48 }
 0x421   : > { %3237 = vmatmul.mubr.bf16.vlgmr.msra.gmra.mrb[8].mxu0 %v2869_v18 }
 0x422   : > { %3246 = vmatpush1.bf16.msra.mxu0 %v4784_v49  ;;  %3277 = vmatprep.mubr.bf16.mxu0 %v2872_v52  ;;  %v4096_v52 = vld [vmem:[%s5719_s10] ss:$0 sm:$0xff] }
 0x423   : > { %3247 = vmatprep.subr.bf16.mxu0 %v4789_v51 }
 0x426   : > { %3248 = vmatpush1.bf16.msra.mxu0 %v4787_v19 }
 0x427   : > { %3249 = vmatprep.subr.bf16.mxu0 %v4792_v53 }
 0x42a   : > { %3250 = vmatpush1.bf16.msra.mxu0 %v4790_v24 }
 0x42b   : > { %3251 = vmatprep.subr.bf16.mxu0 %v4795_v54 }
 0x42e   : > { %3252 = vmatpush1.bf16.msra.mxu0 %v4793_v55 }
 0x42f   : > { %3253 = vmatprep.subr.bf16.mxu0 %v4798_v56 }
 0x432   : > { %3254 = vmatpush1.bf16.msra.mxu0 %v4796_v57 }
 0x433   : > { %3255 = vmatprep.subr.bf16.mxu0 %v4801_v58 }
 0x436   : > { %3256 = vmatpush1.bf16.msra.mxu0 %v4799_v59 }
 0x437   : > { %3257 = vmatprep.subr.bf16.mxu0 %v4804_v60 }
 0x43a   : > { %3258 = vmatpush1.bf16.msra.mxu0 %v4802_v61 }
 0x43b   : > { %3259 = vmatprep.subr.bf16.mxu0 %v4807_v62 }
 0x43e   : > { %3260 = vmatpush1.bf16.msra.mxu0 %v4805_v63 }
 0x43f   : > { %3261 = vmatprep.subr.bf16.mxu0 %v4810_v1 }
 0x442   : > { %3262 = vmatpush1.bf16.msra.mxu0 %v4808_v2 }
 0x443   : > { %3263 = vmatprep.subr.bf16.mxu0 %v4813_v3 }
 0x446   : > { %3264 = vmatpush1.bf16.msra.mxu0 %v4811_v4 }
 0x447   : > { %3265 = vmatprep.subr.bf16.mxu0 %v4816_v5 }
 0x44a   : > { %3266 = vmatpush1.bf16.msra.mxu0 %v4814_v6 }
 0x44b   : > { %3267 = vmatprep.subr.bf16.mxu0 %v4819_v7 }
 0x44e   : > { %3268 = vmatpush1.bf16.msra.mxu0 %v4817_v8 }
 0x44f   : > { %3269 = vmatprep.subr.bf16.mxu0 %v4822_v29 }
 0x452   : > { %3270 = vmatpush1.bf16.msra.mxu0 %v4820_v9 }
 0x453   : > { %3271 = vmatprep.subr.bf16.mxu0 %v4825_v10 }
 0x456   : > { %3272 = vmatpush1.bf16.msra.mxu0 %v4823_v11 }
 0x457   : > { %3273 = vmatprep.subr.bf16.mxu0 %v4828_v12 }
 0x45a   : > { %3274 = vmatpush1.bf16.msra.mxu0 %v4826_v13 }
 0x45b   : > { %3275 = vmatprep.subr.bf16.mxu0 %v4831_v15 }
 0x45e   : > { %3276 = vmatpush1.bf16.msra.mxu0 %v4829_v16 }
 0x461   : > { %3278 = vmatmul.mubr.bf16.vlgmr.msra.gmra.mrb[8].mxu0 %v2871_v17 }
 0x534   : > { %v3279_v27 = vpop.f32.mrb[8].mxu0 }
 0x535   : > { %v4170_v28 = vadd.f32 %v3279_v27, %v2877_v25  ;;  %v3281_v30 = vpop.f32.mrb[9].mxu0 }
 0x536   : > { %v4171_v31 = vadd.f32 %v3281_v30, %v2881_v26  ;;  %v3283_v32 = vpop.f32.mrb[10].mxu0 }
 0x537   : > { %v3284_v33 = vpop.f32.mrb[11].mxu0  ;;  %v3319_v38 = vpack.c.bf16 %v4170_v28, %v4170_v28 }
 0x538   : > { %v3320_v35 = vpack.c.bf16 %v4171_v31, %v4171_v31 }
 0x53a   : > { %3455 = vmatprep.mubr.bf16.mxu1 %v3320_v35 }
 0x53b   : > { %3456 = vmatmul.mubr.bf16.vlgmr.msra.gmra.mrb[8].mxu1 %v3319_v38 }
 0x53c   : > { %4143 = vmatpush3.bf16.msra.mxu1 %v4848_v36  ;;  %4158 = vmatprep.mubr.msk.bf16.mxu1 %vm5154_vm0, %v5153_v23 }
 0x53d   : > { %4144 = vmatprep.subr.bf16.mxu1 %v5153_v23 }
 0x540   : > { %4145 = vmatpush3.bf16.msra.mxu1 %v4849_v39 }
 0x541   : > { %4146 = vmatprep.subr.bf16.mxu1 %v5153_v23 }
 0x544   : > { %4147 = vmatpush3.bf16.msra.mxu1 %v4850_v40 }
 0x545   : > { %4148 = vmatprep.subr.bf16.mxu1 %v5153_v23 }
 0x548   : > { %4149 = vmatpush3.bf16.msra.mxu1 %v4851_v50 }
 0x549   : > { %4150 = vmatprep.subr.bf16.mxu1 %v5153_v23 }
 0x54c   : > { %4151 = vmatpush3.bf16.msra.mxu1 %v4852_v34 }
 0x54d   : > { %4152 = vmatprep.subr.bf16.mxu1 %v5153_v23 }
 0x550   : > { %4153 = vmatpush3.bf16.msra.mxu1 %v4853_v41 }
 0x551   : > { %4154 = vmatprep.subr.bf16.mxu1 %v5153_v23 }
 0x554   : > { %4155 = vmatpush3.bf16.msra.mxu1 %v4854_v42 }
 0x555   : > { %4156 = vmatprep.subr.bf16.mxu1 %v5153_v23 }
 0x558   : > { %4157 = vmatpush3.bf16.msra.mxu1 %v4855_v43 }
 0x60e   : > { %v4127_v44 = vpop.f32.mrb[8].mxu1 }
 0x60f   : > { %v4128_v46 = vpop.f32.mrb[9].mxu1 }
 0x610   : > { %v4129_v47 = vadd.f32 %v4128_v46, %v4127_v44  ;;  %v4130_v48 = vpop.f32.mrb[10].mxu1 }
 0x611   : > { %v4131_v49 = vpop.f32.mrb[11].mxu1 }
 0x612   : > { %v3458_v18 = vadd.f32 %v4129_v47, %v4079_v45 }
 0x614   : > { %v3480_v51 = vpack.c.bf16 %v3458_v18, %v3458_v18 }
 0x616   : > { %4159 = vmatmul.mubr.bf16.vlgmr.msra.gmra.mrb[12].mxu1 %v3480_v51 }
 0x6e9   : > { %v3569_v19 = vpop.f32.mrb[12].mxu1 }
 0x6ea   : > { %v3570_v53 = vadd.f32 %v4096_v52, %v3569_v19  ;;  %v4160_v24 = vpop.f32.mrb[13].mxu1 }
 0x6eb   : > { %v3572_v54 = vpop.f32.mrb[14].mxu1 }
 0x6ec   : > { %3575 = vst [vmem:[#allocation15] sm:$0xff] %v3570_v53  ;;  %v4161_v55 = vpop.f32.mrb[15].mxu1 }
 0x6ed PF: > { %p4254_p11 = scmp.eq.s32.totalorder %s5247_s14, 3  ;;  %s5155_s19 = smov [#allocation15]  }
 0x6ee   : > { %s3583_s29 = sshll.u32 %s5155_s19, 4  ;;  %s3584_s29 = int_to_ptr.vmem [resolvable:$true] %s3583_s29 }
 0x6ef   : > { %s5056_s15 = scalar_lea.vmem %s3584_s29, 128  ;;  %p5063_p7 = scmp.lt.s32.totalorder %s3584_s29, %s3584_s29 }
 0x6f0   : > { %p5057_p4 = scmp.ne.s32.totalorder %s3584_s29, %s5056_s15  ;;  %p5064_p3 = scmp.lt.s32.totalorder %s5056_s15, %s5056_s15 }
 0x6f2   : > { %p5058_p0 = pnand %p5057_p4, %p4254_p11  ;;  %p5065_p6 = por %p5064_p3, %p5063_p7 }
 0x6f4   : > { %p5059_p2 = pneg %p5058_p0 }
 0x6f6   : > { %p5066_p13 = pnand %p5065_p6, %p5059_p2 }
 0x6f8   : > { %5069 = shalt.err (!%p5066_p13)
}
 0x6f9   : > { %s5720_s6 = sld [smem:[#allocation27_spill]] }
 0x6ff   : > { %s5070_s28 = scalar_lea.hbm %s5720_s6, 128 }
 0x700   : > { %p5071_p9 = scmp.ne.s32.totalorder %s5720_s6, %s5070_s28  ;;  %p5076_p8 = scmp.lt.u32.totalorder %s5070_s28, %s5720_s6 }
 0x702   : > { %p5072_p10 = pnand %p5071_p9, %p4254_p11 }
 0x704   : > { %p5073_p12 = pneg %p5072_p10 }
 0x706   : > { %p5078_p5 = pnand %p5076_p8, %p5073_p12 }
 0x708   : > { %5081 = shalt.err (!%p5078_p5)
}
 0x709   : > { %4217 = dma.vmem_to_hbm [thread:$0]  (%p4254_p11), %s3584_s29, 128, %s5720_s6, [#allocation5]  }
 0x70a   : > { %5119 = dma.done.wait (%p4254_p11), [#allocation5], 128  }
 0x70b   : > { %5121 = vsyncadd (%p4254_p11), [#allocation5], 4294967168 }
 0x70c PF: > { %p29_p1 = scmp.ge.s32.totalorder %s5395_s18, 6   ;;  %s5721_s25 = smov %s5128_s26 }
 0x70d   : > { %s5722_s26 = smov %s5132_s27  ;;  %s5723_s27 = smov %s5406_s13 }
 0x70e   : > { %s5724_s28 = smov %s5395_s18  ;;  %31 = sbr.rel (!%p29_p1) target bundleno = 15 (0xf), region = 150 }
 0x715   :  { %3596 = vsyncpa [#allocation4], 1 }
 0x716   :  { %3598 = vsyncpa [#allocation4 + $0x1], 1 }
 0x717   :  { %3599 = vsyncpa [#allocation7], 1 }
 0x718   :  { %3601 = vsyncpa [#allocation7 + $0x1], 1 }
 0x719   :  { %3602 = vsyncpa [#allocation10], 1 }
 0x71a   :  { %3603 = vsyncpa [#allocation13], 1 }
 0x71b   :  { %3604 = vsyncpa [#allocation5], 1 }
 0x71c   :  { %3606 = vsyncpa [#allocation5 + $0x1], 1 }

</bundles_post_ra>
